<compile_context>
chip_gen: v7x
topology: tpu7x:2x2x1
jax: 0.10.0
libtpu: 0.0.40
codegen_flags: <defaults>
</compile_context>

<pallas_src>
import jax
import jax.numpy as jnp
from jax import lax
from jax.experimental import pallas as pl
from jax.experimental.pallas import tpu as pltpu  # noqa: F401  (TPU backend assumed)


# --------------------------- fused Pallas kernel ----------------------------


def _fused_forward_kernel(patches_ref, wc_ref, bc_ref, fcw_ref, fcb_ref,
                          conv_ref, relu_ref, logits_ref):
    """conv1 (im2col matmul + bias) -> relu -> fc, all VMEM/vreg resident, one launch.

    patches_ref: [K, M]        K = 9*Cin rows ordered (kh,kw,cin); M = N*H*W lanes ordered (n,h,w)
    wc_ref:      [Cout, K]     conv weight as matmul matrix (channels in sublanes)
    bc_ref:      [Cout, 1]     conv bias (broadcasts along lanes)
    fcw_ref:     [O, Cout*HW]  fc weight in native PyTorch [out, in] layout (in = NCHW-flat)
    fcb_ref:     [1, O]        fc bias
    conv_ref:    [N, Cout, HW] hook #1 (free contiguous reshape to [N, Cout*HW] outside)
    relu_ref:    [N, Cout, HW] hook #2
    logits_ref:  [N, O]        fc output (forward() return value)
    """
    n_batch, cout, hw = conv_ref.shape
    n_cls = logits_ref.shape[1]

    # conv1: one lane-dense MXU matmul; channels in sublanes, (n, hw) in lanes.
    conv_all = jnp.dot(wc_ref[...], patches_ref[...],
                       preferred_element_type=jnp.float32) + bc_ref[...]   # [Cout, N*HW]
    relu_all = jnp.maximum(conv_all, 0.0)

    # Hook outputs: per-sample 256-lane-aligned slices -> full-tile unmasked stores.
    relu_tiles = []
    for n in range(n_batch):                     # static unroll, N is small
        sl = slice(n * hw, (n + 1) * hw)
        conv_ref[n] = conv_all[:, sl]            # [Cout, HW] tile store, lane-dense
        r_n = relu_all[:, sl]
        relu_ref[n] = r_n
        relu_tiles.append(r_n)

    # fc: logits[n, o] = sum_c sum_hw relu[n, c, hw] * fcw[o, c*HW + hw] + b[o]
    # Done as Cout channel-partial MXU dots ([N, HW] x [O, HW]^T, transposed-B
    # contraction), keeping the fc weight in its native [O, F] layout.
    acc = jnp.zeros((n_batch, n_cls), jnp.float32)
    for c in range(cout):                        # static unroll, Cout = 8
        r_c = jnp.concatenate(
            [relu_tiles[n][c:c + 1, :] for n in range(n_batch)], axis=0)    # [N, HW]
        w_c = fcw_ref[:, c * hw:(c + 1) * hw]                               # [O, HW]
        acc = acc + lax.dot_general(
            r_c, w_c, dimension_numbers=(((1,), (1,)), ((), ())),
            preferred_element_type=jnp.float32)
    logits_ref[...] = acc + fcb_ref[...]


# ------------------------- jitted forward wrapper ---------------------------


def _forward_impl(x_nchw, wc_mat, conv_b2, fc_w, fc_b2):
    N, Cin, H, W = x_nchw.shape
    Cout, K = wc_mat.shape
    n_cls = fc_b2.shape[-1]
    HW = H * W
    M = N * HW

    # im2col (3x3, stride 1, pad 1): rows (kh,kw,cin), columns (n,h,w), then
    # transposed to [K, M] so the conv matmul / intermediates are lane-dense.
    # Cheap XLA, fused under jit, off the kernel's critical path.
    x_nhwc = jnp.transpose(x_nchw, (0, 2, 3, 1)).astype(jnp.float32)
    xp = jnp.pad(x_nhwc, ((0, 0), (1, 1), (1, 1), (0, 0)))
    patches = jnp.concatenate(
        [xp[:, dh:dh + H, dw:dw + W, :] for dh in range(3) for dw in range(3)],
        axis=-1,
    ).reshape(M, K)
    patches_t = patches.T                                   # [K, M]

    conv3, relu3, logits = pl.pallas_call(
        _fused_forward_kernel,
        out_shape=(
            jax.ShapeDtypeStruct((N, Cout, HW), jnp.float32),
            jax.ShapeDtypeStruct((N, Cout, HW), jnp.float32),
            jax.ShapeDtypeStruct((N, n_cls), jnp.float32),
        ),
        in_specs=[
            pl.BlockSpec((K, M), lambda: (0, 0)),
            pl.BlockSpec((Cout, K), lambda: (0, 0)),
            pl.BlockSpec((Cout, 1), lambda: (0, 0)),
            pl.BlockSpec((n_cls, Cout * HW), lambda: (0, 0)),
            pl.BlockSpec((1, n_cls), lambda: (0, 0)),
        ],
        out_specs=(
            pl.BlockSpec((N, Cout, HW), lambda: (0, 0, 0)),
            pl.BlockSpec((N, Cout, HW), lambda: (0, 0, 0)),
            pl.BlockSpec((N, n_cls), lambda: (0, 0)),
        ),
    )(patches_t, wc_mat, conv_b2, fc_w, fc_b2)

    # Hook tensors are already in NCHW element order: reshape is contiguous (free).
    return logits, conv3.reshape(N, Cout * HW), relu3.reshape(N, Cout * HW)


_forward_jit = jax.jit(_forward_impl)


# --------------------------------- model ------------------------------------


class SmallConvNet:
    """Synthetic `model`: named children conv1 -> relu -> fc (10-way classifier)."""

    def __init__(self, key, cin=4, cout=8, hw=16, n_classes=10):
        k1, k2, k3, k4 = jax.random.split(key, 4)
        self.cin, self.cout, self.hw, self.n_classes = cin, cout, hw, n_classes
        self.conv_w = jax.random.normal(k1, (cout, cin, 3, 3), jnp.float32) / jnp.sqrt(
            9.0 * cin
        )  # PyTorch OIHW layout
        self.conv_b = 0.01 * jax.random.normal(k2, (cout,), jnp.float32)
        fan_in = cout * hw * hw
        self.fc_w = jax.random.normal(k3, (n_classes, fan_in), jnp.float32) / jnp.sqrt(
            float(fan_in)
        )  # PyTorch [out, in] layout (input = NCHW-flattened relu)
        self.fc_b = 0.01 * jax.random.normal(k4, (n_classes,), jnp.float32)


class MIEstimatorPallas:
    """JAX/Pallas port of MI_estimator's forward (model + forward-hook activations)."""

    def __init__(self, model: SmallConvNet):
        self.model = model
        self.MI_hM_X_upper = []
        self.MI_hM_Y_upper = []
        self.activation_list = []
        self.layer_name = ["conv1", "relu", "fc"]

        m = model
        # Hoisted weight-layout prep (done once, not per forward call):
        #   conv OIHW -> [Cout, (kh,kw,cin)] matmul matrix (channels in sublanes)
        self.wc_mat = jnp.transpose(m.conv_w, (0, 2, 3, 1)).reshape(m.cout, 9 * m.cin)
        self.conv_b2 = m.conv_b.reshape(m.cout, 1).astype(jnp.float32)
        #   fc weight stays in native PyTorch [O, Cout*HW] layout (lane-dense tile)
        self.fc_w2 = m.fc_w.astype(jnp.float32)
        self.fc_b2 = m.fc_b.reshape(1, m.n_classes).astype(jnp.float32)

    def forward(self, x_nchw):
        logits, conv_flat, relu_flat = _forward_jit(
            x_nchw, self.wc_mat, self.conv_b2, self.fc_w2, self.fc_b2
        )
        # Emulate the PyTorch forward hooks: append output.view(N, -1) per child.
        self.activation_list.append(conv_flat)
        self.activation_list.append(relu_flat)
        self.activation_list.append(logits)
        return logits

    __call__ = forward


# ------------------------------ reference -----------------------------------


def reference_forward(model, x_nchw):
    out = jax.lax.conv_general_dilated(
        x_nchw,
        model.conv_w,
        window_strides=(1, 1),
        padding=((1, 1), (1, 1)),
        dimension_numbers=("NCHW", "OIHW", "NCHW"),
    ) + model.conv_b.reshape(1, -1, 1, 1)
    out = jnp.maximum(out, 0.0)
    flat = out.reshape(out.shape[0], -1)
    return flat @ model.fc_w.T + model.fc_b


# --------------------------------- main --------------------------------------

if __name__ == "__main__":
    key = jax.random.PRNGKey(0)
    k_x, k_model = jax.random.split(key)

    N, Cin, H, W = 8, 4, 16, 16  # small NCHW image batch; HW=256 keeps layouts lane-dense
    x = jax.random.normal(k_x, (N, Cin, H, W), jnp.float32)

    model = SmallConvNet(k_model, cin=Cin, cout=8, hw=H, n_classes=10)
    estimator = MIEstimatorPallas(model)

    logits = estimator(x)
    logits = jax.block_until_ready(logits)

    # sanity checks against a plain-JAX reference of the same forward
    ref = reference_forward(model, x)
    ref_conv = jax.lax.conv_general_dilated(
        x, model.conv_w, (1, 1), ((1, 1), (1, 1)),
        dimension_numbers=("NCHW", "OIHW", "NCHW"),
    ) + model.conv_b.reshape(1, -1, 1, 1)

    assert logits.shape == (N, 10)
    assert len(estimator.activation_list) == 3
    assert estimator.activation_list[0].shape == (N, 8 * H * W)
    assert estimator.activation_list[1].shape == (N, 8 * H * W)
    assert estimator.activation_list[2].shape == (N, 10)
    assert jnp.allclose(estimator.activation_list[0], ref_conv.reshape(N, -1),
                        atol=1e-4, rtol=1e-4)
    assert jnp.allclose(estimator.activation_list[1],
                        jnp.maximum(ref_conv, 0.0).reshape(N, -1),
                        atol=1e-4, rtol=1e-4)
    assert jnp.allclose(logits, ref, atol=1e-4, rtol=1e-4)

    print("KERNEL_OK")
</pallas_src>

<mosaic_0001>
module attributes {stable_mosaic.version = 11 : i64} {
  func.func @_fused_forward_kernel(%arg0: memref<36x2048xf32, #tpu.memory_space<vmem>>, %arg1: memref<8x36xf32, #tpu.memory_space<vmem>>, %arg2: memref<8x1xf32, #tpu.memory_space<vmem>>, %arg3: memref<10x2048xf32, #tpu.memory_space<vmem>>, %arg4: memref<1x10xf32, #tpu.memory_space<vmem>>, %arg5: memref<8x8x256xf32, #tpu.memory_space<vmem>>, %arg6: memref<8x8x256xf32, #tpu.memory_space<vmem>>, %arg7: memref<8x10xf32, #tpu.memory_space<vmem>>) attributes {dimension_semantics = [], scalar_prefetch = 0 : i64, scratch_operands = 0 : i64, tpu.core_type = #tpu.core_type<tc>} {
    %c0 = arith.constant 0 : index
    %c0_0 = arith.constant 0 : index
    %0 = vector.load %arg1[%c0, %c0_0] : memref<8x36xf32, #tpu.memory_space<vmem>>, vector<8x36xf32>
    %c0_1 = arith.constant 0 : index
    %c0_2 = arith.constant 0 : index
    %1 = vector.load %arg0[%c0_1, %c0_2] : memref<36x2048xf32, #tpu.memory_space<vmem>>, vector<36x2048xf32>
    %cst = arith.constant dense<0.000000e+00> : vector<8x2048xf32>
    %2 = tpu.matmul %0, %1, %cst {dimension_numbers = #tpu.dot_dimension_numbers<[1], [0], [0], [1], [0, 0, 1, 1], [], []>} : vector<8x36xf32>, vector<36x2048xf32>, vector<8x2048xf32> -> vector<8x2048xf32>
    %c0_3 = arith.constant 0 : index
    %c0_4 = arith.constant 0 : index
    %3 = vector.load %arg2[%c0_3, %c0_4] : memref<8x1xf32, #tpu.memory_space<vmem>>, vector<8x1xf32>
    %4 = vector.broadcast %3 : vector<8x1xf32> to vector<8x2048xf32>
    %5 = arith.addf %2, %4 : vector<8x2048xf32>
    %cst_5 = arith.constant 0.000000e+00 : f32
    %6 = vector.broadcast %cst_5 : f32 to vector<8x2048xf32>
    %7 = arith.maximumf %5, %6 : vector<8x2048xf32>
    %8 = vector.extract_strided_slice %5 {offsets = [0, 0], sizes = [8, 256], strides = [1, 1]} : vector<8x2048xf32> to vector<8x256xf32>
    %c0_6 = arith.constant 0 : index
    %c0_7 = arith.constant 0 : index
    %c0_8 = arith.constant 0 : index
    %9 = vector.load %arg5[%c0_6, %c0_7, %c0_8] : memref<8x8x256xf32, #tpu.memory_space<vmem>>, vector<1x8x256xf32>
    %10 = vector.shape_cast %9 : vector<1x8x256xf32> to vector<8x256xf32>
    %11 = vector.shape_cast %8 : vector<8x256xf32> to vector<1x8x256xf32>
    tpu.vector_store %arg5[%c0_6, %c0_7, %c0_8], %11 {strides = array<i32>} : memref<8x8x256xf32, #tpu.memory_space<vmem>>, vector<1x8x256xf32>,
    %12 = vector.extract_strided_slice %7 {offsets = [0, 0], sizes = [8, 256], strides = [1, 1]} : vector<8x2048xf32> to vector<8x256xf32>
    %c0_9 = arith.constant 0 : index
    %c0_10 = arith.constant 0 : index
    %c0_11 = arith.constant 0 : index
    %13 = vector.load %arg6[%c0_9, %c0_10, %c0_11] : memref<8x8x256xf32, #tpu.memory_space<vmem>>, vector<1x8x256xf32>
    %14 = vector.shape_cast %13 : vector<1x8x256xf32> to vector<8x256xf32>
    %15 = vector.shape_cast %12 : vector<8x256xf32> to vector<1x8x256xf32>
    tpu.vector_store %arg6[%c0_9, %c0_10, %c0_11], %15 {strides = array<i32>} : memref<8x8x256xf32, #tpu.memory_space<vmem>>, vector<1x8x256xf32>,
    %16 = vector.extract_strided_slice %5 {offsets = [0, 256], sizes = [8, 256], strides = [1, 1]} : vector<8x2048xf32> to vector<8x256xf32>
    %c1 = arith.constant 1 : index
    %c0_12 = arith.constant 0 : index
    %c0_13 = arith.constant 0 : index
    %17 = vector.load %arg5[%c1, %c0_12, %c0_13] : memref<8x8x256xf32, #tpu.memory_space<vmem>>, vector<1x8x256xf32>
    %18 = vector.shape_cast %17 : vector<1x8x256xf32> to vector<8x256xf32>
    %19 = vector.shape_cast %16 : vector<8x256xf32> to vector<1x8x256xf32>
    tpu.vector_store %arg5[%c1, %c0_12, %c0_13], %19 {strides = array<i32>} : memref<8x8x256xf32, #tpu.memory_space<vmem>>, vector<1x8x256xf32>,
    %20 = vector.extract_strided_slice %7 {offsets = [0, 256], sizes = [8, 256], strides = [1, 1]} : vector<8x2048xf32> to vector<8x256xf32>
    %c1_14 = arith.constant 1 : index
    %c0_15 = arith.constant 0 : index
    %c0_16 = arith.constant 0 : index
    %21 = vector.load %arg6[%c1_14, %c0_15, %c0_16] : memref<8x8x256xf32, #tpu.memory_space<vmem>>, vector<1x8x256xf32>
    %22 = vector.shape_cast %21 : vector<1x8x256xf32> to vector<8x256xf32>
    %23 = vector.shape_cast %20 : vector<8x256xf32> to vector<1x8x256xf32>
    tpu.vector_store %arg6[%c1_14, %c0_15, %c0_16], %23 {strides = array<i32>} : memref<8x8x256xf32, #tpu.memory_space<vmem>>, vector<1x8x256xf32>,
    %24 = vector.extract_strided_slice %5 {offsets = [0, 512], sizes = [8, 256], strides = [1, 1]} : vector<8x2048xf32> to vector<8x256xf32>
    %c2 = arith.constant 2 : index
    %c0_17 = arith.constant 0 : index
    %c0_18 = arith.constant 0 : index
    %25 = vector.load %arg5[%c2, %c0_17, %c0_18] : memref<8x8x256xf32, #tpu.memory_space<vmem>>, vector<1x8x256xf32>
    %26 = vector.shape_cast %25 : vector<1x8x256xf32> to vector<8x256xf32>
    %27 = vector.shape_cast %24 : vector<8x256xf32> to vector<1x8x256xf32>
    tpu.vector_store %arg5[%c2, %c0_17, %c0_18], %27 {strides = array<i32>} : memref<8x8x256xf32, #tpu.memory_space<vmem>>, vector<1x8x256xf32>,
    %28 = vector.extract_strided_slice %7 {offsets = [0, 512], sizes = [8, 256], strides = [1, 1]} : vector<8x2048xf32> to vector<8x256xf32>
    %c2_19 = arith.constant 2 : index
    %c0_20 = arith.constant 0 : index
    %c0_21 = arith.constant 0 : index
    %29 = vector.load %arg6[%c2_19, %c0_20, %c0_21] : memref<8x8x256xf32, #tpu.memory_space<vmem>>, vector<1x8x256xf32>
    %30 = vector.shape_cast %29 : vector<1x8x256xf32> to vector<8x256xf32>
    %31 = vector.shape_cast %28 : vector<8x256xf32> to vector<1x8x256xf32>
    tpu.vector_store %arg6[%c2_19, %c0_20, %c0_21], %31 {strides = array<i32>} : memref<8x8x256xf32, #tpu.memory_space<vmem>>, vector<1x8x256xf32>,
    %32 = vector.extract_strided_slice %5 {offsets = [0, 768], sizes = [8, 256], strides = [1, 1]} : vector<8x2048xf32> to vector<8x256xf32>
    %c3 = arith.constant 3 : index
    %c0_22 = arith.constant 0 : index
    %c0_23 = arith.constant 0 : index
    %33 = vector.load %arg5[%c3, %c0_22, %c0_23] : memref<8x8x256xf32, #tpu.memory_space<vmem>>, vector<1x8x256xf32>
    %34 = vector.shape_cast %33 : vector<1x8x256xf32> to vector<8x256xf32>
    %35 = vector.shape_cast %32 : vector<8x256xf32> to vector<1x8x256xf32>
    tpu.vector_store %arg5[%c3, %c0_22, %c0_23], %35 {strides = array<i32>} : memref<8x8x256xf32, #tpu.memory_space<vmem>>, vector<1x8x256xf32>,
    %36 = vector.extract_strided_slice %7 {offsets = [0, 768], sizes = [8, 256], strides = [1, 1]} : vector<8x2048xf32> to vector<8x256xf32>
    %c3_24 = arith.constant 3 : index
    %c0_25 = arith.constant 0 : index
    %c0_26 = arith.constant 0 : index
    %37 = vector.load %arg6[%c3_24, %c0_25, %c0_26] : memref<8x8x256xf32, #tpu.memory_space<vmem>>, vector<1x8x256xf32>
    %38 = vector.shape_cast %37 : vector<1x8x256xf32> to vector<8x256xf32>
    %39 = vector.shape_cast %36 : vector<8x256xf32> to vector<1x8x256xf32>
    tpu.vector_store %arg6[%c3_24, %c0_25, %c0_26], %39 {strides = array<i32>} : memref<8x8x256xf32, #tpu.memory_space<vmem>>, vector<1x8x256xf32>,
    %40 = vector.extract_strided_slice %5 {offsets = [0, 1024], sizes = [8, 256], strides = [1, 1]} : vector<8x2048xf32> to vector<8x256xf32>
    %c4 = arith.constant 4 : index
    %c0_27 = arith.constant 0 : index
    %c0_28 = arith.constant 0 : index
    %41 = vector.load %arg5[%c4, %c0_27, %c0_28] : memref<8x8x256xf32, #tpu.memory_space<vmem>>, vector<1x8x256xf32>
    %42 = vector.shape_cast %41 : vector<1x8x256xf32> to vector<8x256xf32>
    %43 = vector.shape_cast %40 : vector<8x256xf32> to vector<1x8x256xf32>
    tpu.vector_store %arg5[%c4, %c0_27, %c0_28], %43 {strides = array<i32>} : memref<8x8x256xf32, #tpu.memory_space<vmem>>, vector<1x8x256xf32>,
    %44 = vector.extract_strided_slice %7 {offsets = [0, 1024], sizes = [8, 256], strides = [1, 1]} : vector<8x2048xf32> to vector<8x256xf32>
    %c4_29 = arith.constant 4 : index
    %c0_30 = arith.constant 0 : index
    %c0_31 = arith.constant 0 : index
    %45 = vector.load %arg6[%c4_29, %c0_30, %c0_31] : memref<8x8x256xf32, #tpu.memory_space<vmem>>, vector<1x8x256xf32>
    %46 = vector.shape_cast %45 : vector<1x8x256xf32> to vector<8x256xf32>
    %47 = vector.shape_cast %44 : vector<8x256xf32> to vector<1x8x256xf32>
    tpu.vector_store %arg6[%c4_29, %c0_30, %c0_31], %47 {strides = array<i32>} : memref<8x8x256xf32, #tpu.memory_space<vmem>>, vector<1x8x256xf32>,
    %48 = vector.extract_strided_slice %5 {offsets = [0, 1280], sizes = [8, 256], strides = [1, 1]} : vector<8x2048xf32> to vector<8x256xf32>
    %c5 = arith.constant 5 : index
    %c0_32 = arith.constant 0 : index
    %c0_33 = arith.constant 0 : index
    %49 = vector.load %arg5[%c5, %c0_32, %c0_33] : memref<8x8x256xf32, #tpu.memory_space<vmem>>, vector<1x8x256xf32>
    %50 = vector.shape_cast %49 : vector<1x8x256xf32> to vector<8x256xf32>
    %51 = vector.shape_cast %48 : vector<8x256xf32> to vector<1x8x256xf32>
    tpu.vector_store %arg5[%c5, %c0_32, %c0_33], %51 {strides = array<i32>} : memref<8x8x256xf32, #tpu.memory_space<vmem>>, vector<1x8x256xf32>,
    %52 = vector.extract_strided_slice %7 {offsets = [0, 1280], sizes = [8, 256], strides = [1, 1]} : vector<8x2048xf32> to vector<8x256xf32>
    %c5_34 = arith.constant 5 : index
    %c0_35 = arith.constant 0 : index
    %c0_36 = arith.constant 0 : index
    %53 = vector.load %arg6[%c5_34, %c0_35, %c0_36] : memref<8x8x256xf32, #tpu.memory_space<vmem>>, vector<1x8x256xf32>
    %54 = vector.shape_cast %53 : vector<1x8x256xf32> to vector<8x256xf32>
    %55 = vector.shape_cast %52 : vector<8x256xf32> to vector<1x8x256xf32>
    tpu.vector_store %arg6[%c5_34, %c0_35, %c0_36], %55 {strides = array<i32>} : memref<8x8x256xf32, #tpu.memory_space<vmem>>, vector<1x8x256xf32>,
    %56 = vector.extract_strided_slice %5 {offsets = [0, 1536], sizes = [8, 256], strides = [1, 1]} : vector<8x2048xf32> to vector<8x256xf32>
    %c6 = arith.constant 6 : index
    %c0_37 = arith.constant 0 : index
    %c0_38 = arith.constant 0 : index
    %57 = vector.load %arg5[%c6, %c0_37, %c0_38] : memref<8x8x256xf32, #tpu.memory_space<vmem>>, vector<1x8x256xf32>
    %58 = vector.shape_cast %57 : vector<1x8x256xf32> to vector<8x256xf32>
    %59 = vector.shape_cast %56 : vector<8x256xf32> to vector<1x8x256xf32>
    tpu.vector_store %arg5[%c6, %c0_37, %c0_38], %59 {strides = array<i32>} : memref<8x8x256xf32, #tpu.memory_space<vmem>>, vector<1x8x256xf32>,
    %60 = vector.extract_strided_slice %7 {offsets = [0, 1536], sizes = [8, 256], strides = [1, 1]} : vector<8x2048xf32> to vector<8x256xf32>
    %c6_39 = arith.constant 6 : index
    %c0_40 = arith.constant 0 : index
    %c0_41 = arith.constant 0 : index
    %61 = vector.load %arg6[%c6_39, %c0_40, %c0_41] : memref<8x8x256xf32, #tpu.memory_space<vmem>>, vector<1x8x256xf32>
    %62 = vector.shape_cast %61 : vector<1x8x256xf32> to vector<8x256xf32>
    %63 = vector.shape_cast %60 : vector<8x256xf32> to vector<1x8x256xf32>
    tpu.vector_store %arg6[%c6_39, %c0_40, %c0_41], %63 {strides = array<i32>} : memref<8x8x256xf32, #tpu.memory_space<vmem>>, vector<1x8x256xf32>,
    %64 = vector.extract_strided_slice %5 {offsets = [0, 1792], sizes = [8, 256], strides = [1, 1]} : vector<8x2048xf32> to vector<8x256xf32>
    %c7 = arith.constant 7 : index
    %c0_42 = arith.constant 0 : index
    %c0_43 = arith.constant 0 : index
    %65 = vector.load %arg5[%c7, %c0_42, %c0_43] : memref<8x8x256xf32, #tpu.memory_space<vmem>>, vector<1x8x256xf32>
    %66 = vector.shape_cast %65 : vector<1x8x256xf32> to vector<8x256xf32>
    %67 = vector.shape_cast %64 : vector<8x256xf32> to vector<1x8x256xf32>
    tpu.vector_store %arg5[%c7, %c0_42, %c0_43], %67 {strides = array<i32>} : memref<8x8x256xf32, #tpu.memory_space<vmem>>, vector<1x8x256xf32>,
    %68 = vector.extract_strided_slice %7 {offsets = [0, 1792], sizes = [8, 256], strides = [1, 1]} : vector<8x2048xf32> to vector<8x256xf32>
    %c7_44 = arith.constant 7 : index
    %c0_45 = arith.constant 0 : index
    %c0_46 = arith.constant 0 : index
    %69 = vector.load %arg6[%c7_44, %c0_45, %c0_46] : memref<8x8x256xf32, #tpu.memory_space<vmem>>, vector<1x8x256xf32>
    %70 = vector.shape_cast %69 : vector<1x8x256xf32> to vector<8x256xf32>
    %71 = vector.shape_cast %68 : vector<8x256xf32> to vector<1x8x256xf32>
    tpu.vector_store %arg6[%c7_44, %c0_45, %c0_46], %71 {strides = array<i32>} : memref<8x8x256xf32, #tpu.memory_space<vmem>>, vector<1x8x256xf32>,
    %cst_47 = arith.constant 0.000000e+00 : f32
    %72 = vector.broadcast %cst_47 : f32 to vector<8x10xf32>
    %73 = vector.extract_strided_slice %12 {offsets = [0, 0], sizes = [1, 256], strides = [1, 1]} : vector<8x256xf32> to vector<1x256xf32>
    %74 = vector.extract_strided_slice %20 {offsets = [0, 0], sizes = [1, 256], strides = [1, 1]} : vector<8x256xf32> to vector<1x256xf32>
    %75 = vector.extract_strided_slice %28 {offsets = [0, 0], sizes = [1, 256], strides = [1, 1]} : vector<8x256xf32> to vector<1x256xf32>
    %76 = vector.extract_strided_slice %36 {offsets = [0, 0], sizes = [1, 256], strides = [1, 1]} : vector<8x256xf32> to vector<1x256xf32>
    %77 = vector.extract_strided_slice %44 {offsets = [0, 0], sizes = [1, 256], strides = [1, 1]} : vector<8x256xf32> to vector<1x256xf32>
    %78 = vector.extract_strided_slice %52 {offsets = [0, 0], sizes = [1, 256], strides = [1, 1]} : vector<8x256xf32> to vector<1x256xf32>
    %79 = vector.extract_strided_slice %60 {offsets = [0, 0], sizes = [1, 256], strides = [1, 1]} : vector<8x256xf32> to vector<1x256xf32>
    %80 = vector.extract_strided_slice %68 {offsets = [0, 0], sizes = [1, 256], strides = [1, 1]} : vector<8x256xf32> to vector<1x256xf32>
    %81 = tpu.concatenate %73, %74, %75, %76, %77, %78, %79, %80 in 0 : vector<1x256xf32>, vector<1x256xf32>, vector<1x256xf32>, vector<1x256xf32>, vector<1x256xf32>, vector<1x256xf32>, vector<1x256xf32>, vector<1x256xf32> -> vector<8x256xf32>
    %c0_48 = arith.constant 0 : index
    %c0_49 = arith.constant 0 : index
    %82 = vector.load %arg3[%c0_48, %c0_49] : memref<10x2048xf32, #tpu.memory_space<vmem>>, vector<10x256xf32>
    %cst_50 = arith.constant dense<0.000000e+00> : vector<8x10xf32>
    %83 = tpu.matmul %81, %82, %cst_50 {dimension_numbers = #tpu.dot_dimension_numbers<[1], [1], [0], [0], [0, 0, 1, 0], [], []>} : vector<8x256xf32>, vector<10x256xf32>, vector<8x10xf32> -> vector<8x10xf32>
    %84 = arith.addf %72, %83 : vector<8x10xf32>
    %85 = vector.extract_strided_slice %12 {offsets = [1, 0], sizes = [1, 256], strides = [1, 1]} : vector<8x256xf32> to vector<1x256xf32>
    %86 = vector.extract_strided_slice %20 {offsets = [1, 0], sizes = [1, 256], strides = [1, 1]} : vector<8x256xf32> to vector<1x256xf32>
    %87 = vector.extract_strided_slice %28 {offsets = [1, 0], sizes = [1, 256], strides = [1, 1]} : vector<8x256xf32> to vector<1x256xf32>
    %88 = vector.extract_strided_slice %36 {offsets = [1, 0], sizes = [1, 256], strides = [1, 1]} : vector<8x256xf32> to vector<1x256xf32>
    %89 = vector.extract_strided_slice %44 {offsets = [1, 0], sizes = [1, 256], strides = [1, 1]} : vector<8x256xf32> to vector<1x256xf32>
    %90 = vector.extract_strided_slice %52 {offsets = [1, 0], sizes = [1, 256], strides = [1, 1]} : vector<8x256xf32> to vector<1x256xf32>
    %91 = vector.extract_strided_slice %60 {offsets = [1, 0], sizes = [1, 256], strides = [1, 1]} : vector<8x256xf32> to vector<1x256xf32>
    %92 = vector.extract_strided_slice %68 {offsets = [1, 0], sizes = [1, 256], strides = [1, 1]} : vector<8x256xf32> to vector<1x256xf32>
    %93 = tpu.concatenate %85, %86, %87, %88, %89, %90, %91, %92 in 0 : vector<1x256xf32>, vector<1x256xf32>, vector<1x256xf32>, vector<1x256xf32>, vector<1x256xf32>, vector<1x256xf32>, vector<1x256xf32>, vector<1x256xf32> -> vector<8x256xf32>
    %c0_51 = arith.constant 0 : index
    %c256 = arith.constant 256 : index
    %94 = vector.load %arg3[%c0_51, %c256] : memref<10x2048xf32, #tpu.memory_space<vmem>>, vector<10x256xf32>
    %cst_52 = arith.constant dense<0.000000e+00> : vector<8x10xf32>
    %95 = tpu.matmul %93, %94, %cst_52 {dimension_numbers = #tpu.dot_dimension_numbers<[1], [1], [0], [0], [0, 0, 1, 0], [], []>} : vector<8x256xf32>, vector<10x256xf32>, vector<8x10xf32> -> vector<8x10xf32>
    %96 = arith.addf %84, %95 : vector<8x10xf32>
    %97 = vector.extract_strided_slice %12 {offsets = [2, 0], sizes = [1, 256], strides = [1, 1]} : vector<8x256xf32> to vector<1x256xf32>
    %98 = vector.extract_strided_slice %20 {offsets = [2, 0], sizes = [1, 256], strides = [1, 1]} : vector<8x256xf32> to vector<1x256xf32>
    %99 = vector.extract_strided_slice %28 {offsets = [2, 0], sizes = [1, 256], strides = [1, 1]} : vector<8x256xf32> to vector<1x256xf32>
    %100 = vector.extract_strided_slice %36 {offsets = [2, 0], sizes = [1, 256], strides = [1, 1]} : vector<8x256xf32> to vector<1x256xf32>
    %101 = vector.extract_strided_slice %44 {offsets = [2, 0], sizes = [1, 256], strides = [1, 1]} : vector<8x256xf32> to vector<1x256xf32>
    %102 = vector.extract_strided_slice %52 {offsets = [2, 0], sizes = [1, 256], strides = [1, 1]} : vector<8x256xf32> to vector<1x256xf32>
    %103 = vector.extract_strided_slice %60 {offsets = [2, 0], sizes = [1, 256], strides = [1, 1]} : vector<8x256xf32> to vector<1x256xf32>
    %104 = vector.extract_strided_slice %68 {offsets = [2, 0], sizes = [1, 256], strides = [1, 1]} : vector<8x256xf32> to vector<1x256xf32>
    %105 = tpu.concatenate %97, %98, %99, %100, %101, %102, %103, %104 in 0 : vector<1x256xf32>, vector<1x256xf32>, vector<1x256xf32>, vector<1x256xf32>, vector<1x256xf32>, vector<1x256xf32>, vector<1x256xf32>, vector<1x256xf32> -> vector<8x256xf32>
    %c0_53 = arith.constant 0 : index
    %c512 = arith.constant 512 : index
    %106 = vector.load %arg3[%c0_53, %c512] : memref<10x2048xf32, #tpu.memory_space<vmem>>, vector<10x256xf32>
    %cst_54 = arith.constant dense<0.000000e+00> : vector<8x10xf32>
    %107 = tpu.matmul %105, %106, %cst_54 {dimension_numbers = #tpu.dot_dimension_numbers<[1], [1], [0], [0], [0, 0, 1, 0], [], []>} : vector<8x256xf32>, vector<10x256xf32>, vector<8x10xf32> -> vector<8x10xf32>
    %108 = arith.addf %96, %107 : vector<8x10xf32>
    %109 = vector.extract_strided_slice %12 {offsets = [3, 0], sizes = [1, 256], strides = [1, 1]} : vector<8x256xf32> to vector<1x256xf32>
    %110 = vector.extract_strided_slice %20 {offsets = [3, 0], sizes = [1, 256], strides = [1, 1]} : vector<8x256xf32> to vector<1x256xf32>
    %111 = vector.extract_strided_slice %28 {offsets = [3, 0], sizes = [1, 256], strides = [1, 1]} : vector<8x256xf32> to vector<1x256xf32>
    %112 = vector.extract_strided_slice %36 {offsets = [3, 0], sizes = [1, 256], strides = [1, 1]} : vector<8x256xf32> to vector<1x256xf32>
    %113 = vector.extract_strided_slice %44 {offsets = [3, 0], sizes = [1, 256], strides = [1, 1]} : vector<8x256xf32> to vector<1x256xf32>
    %114 = vector.extract_strided_slice %52 {offsets = [3, 0], sizes = [1, 256], strides = [1, 1]} : vector<8x256xf32> to vector<1x256xf32>
    %115 = vector.extract_strided_slice %60 {offsets = [3, 0], sizes = [1, 256], strides = [1, 1]} : vector<8x256xf32> to vector<1x256xf32>
    %116 = vector.extract_strided_slice %68 {offsets = [3, 0], sizes = [1, 256], strides = [1, 1]} : vector<8x256xf32> to vector<1x256xf32>
    %117 = tpu.concatenate %109, %110, %111, %112, %113, %114, %115, %116 in 0 : vector<1x256xf32>, vector<1x256xf32>, vector<1x256xf32>, vector<1x256xf32>, vector<1x256xf32>, vector<1x256xf32>, vector<1x256xf32>, vector<1x256xf32> -> vector<8x256xf32>
    %c0_55 = arith.constant 0 : index
    %c768 = arith.constant 768 : index
    %118 = vector.load %arg3[%c0_55, %c768] : memref<10x2048xf32, #tpu.memory_space<vmem>>, vector<10x256xf32>
    %cst_56 = arith.constant dense<0.000000e+00> : vector<8x10xf32>
    %119 = tpu.matmul %117, %118, %cst_56 {dimension_numbers = #tpu.dot_dimension_numbers<[1], [1], [0], [0], [0, 0, 1, 0], [], []>} : vector<8x256xf32>, vector<10x256xf32>, vector<8x10xf32> -> vector<8x10xf32>
    %120 = arith.addf %108, %119 : vector<8x10xf32>
    %121 = vector.extract_strided_slice %12 {offsets = [4, 0], sizes = [1, 256], strides = [1, 1]} : vector<8x256xf32> to vector<1x256xf32>
    %122 = vector.extract_strided_slice %20 {offsets = [4, 0], sizes = [1, 256], strides = [1, 1]} : vector<8x256xf32> to vector<1x256xf32>
    %123 = vector.extract_strided_slice %28 {offsets = [4, 0], sizes = [1, 256], strides = [1, 1]} : vector<8x256xf32> to vector<1x256xf32>
    %124 = vector.extract_strided_slice %36 {offsets = [4, 0], sizes = [1, 256], strides = [1, 1]} : vector<8x256xf32> to vector<1x256xf32>
    %125 = vector.extract_strided_slice %44 {offsets = [4, 0], sizes = [1, 256], strides = [1, 1]} : vector<8x256xf32> to vector<1x256xf32>
    %126 = vector.extract_strided_slice %52 {offsets = [4, 0], sizes = [1, 256], strides = [1, 1]} : vector<8x256xf32> to vector<1x256xf32>
    %127 = vector.extract_strided_slice %60 {offsets = [4, 0], sizes = [1, 256], strides = [1, 1]} : vector<8x256xf32> to vector<1x256xf32>
    %128 = vector.extract_strided_slice %68 {offsets = [4, 0], sizes = [1, 256], strides = [1, 1]} : vector<8x256xf32> to vector<1x256xf32>
    %129 = tpu.concatenate %121, %122, %123, %124, %125, %126, %127, %128 in 0 : vector<1x256xf32>, vector<1x256xf32>, vector<1x256xf32>, vector<1x256xf32>, vector<1x256xf32>, vector<1x256xf32>, vector<1x256xf32>, vector<1x256xf32> -> vector<8x256xf32>
    %c0_57 = arith.constant 0 : index
    %c1024 = arith.constant 1024 : index
    %130 = vector.load %arg3[%c0_57, %c1024] : memref<10x2048xf32, #tpu.memory_space<vmem>>, vector<10x256xf32>
    %cst_58 = arith.constant dense<0.000000e+00> : vector<8x10xf32>
    %131 = tpu.matmul %129, %130, %cst_58 {dimension_numbers = #tpu.dot_dimension_numbers<[1], [1], [0], [0], [0, 0, 1, 0], [], []>} : vector<8x256xf32>, vector<10x256xf32>, vector<8x10xf32> -> vector<8x10xf32>
    %132 = arith.addf %120, %131 : vector<8x10xf32>
    %133 = vector.extract_strided_slice %12 {offsets = [5, 0], sizes = [1, 256], strides = [1, 1]} : vector<8x256xf32> to vector<1x256xf32>
    %134 = vector.extract_strided_slice %20 {offsets = [5, 0], sizes = [1, 256], strides = [1, 1]} : vector<8x256xf32> to vector<1x256xf32>
    %135 = vector.extract_strided_slice %28 {offsets = [5, 0], sizes = [1, 256], strides = [1, 1]} : vector<8x256xf32> to vector<1x256xf32>
    %136 = vector.extract_strided_slice %36 {offsets = [5, 0], sizes = [1, 256], strides = [1, 1]} : vector<8x256xf32> to vector<1x256xf32>
    %137 = vector.extract_strided_slice %44 {offsets = [5, 0], sizes = [1, 256], strides = [1, 1]} : vector<8x256xf32> to vector<1x256xf32>
    %138 = vector.extract_strided_slice %52 {offsets = [5, 0], sizes = [1, 256], strides = [1, 1]} : vector<8x256xf32> to vector<1x256xf32>
    %139 = vector.extract_strided_slice %60 {offsets = [5, 0], sizes = [1, 256], strides = [1, 1]} : vector<8x256xf32> to vector<1x256xf32>
    %140 = vector.extract_strided_slice %68 {offsets = [5, 0], sizes = [1, 256], strides = [1, 1]} : vector<8x256xf32> to vector<1x256xf32>
    %141 = tpu.concatenate %133, %134, %135, %136, %137, %138, %139, %140 in 0 : vector<1x256xf32>, vector<1x256xf32>, vector<1x256xf32>, vector<1x256xf32>, vector<1x256xf32>, vector<1x256xf32>, vector<1x256xf32>, vector<1x256xf32> -> vector<8x256xf32>
    %c0_59 = arith.constant 0 : index
    %c1280 = arith.constant 1280 : index
    %142 = vector.load %arg3[%c0_59, %c1280] : memref<10x2048xf32, #tpu.memory_space<vmem>>, vector<10x256xf32>
    %cst_60 = arith.constant dense<0.000000e+00> : vector<8x10xf32>
    %143 = tpu.matmul %141, %142, %cst_60 {dimension_numbers = #tpu.dot_dimension_numbers<[1], [1], [0], [0], [0, 0, 1, 0], [], []>} : vector<8x256xf32>, vector<10x256xf32>, vector<8x10xf32> -> vector<8x10xf32>
    %144 = arith.addf %132, %143 : vector<8x10xf32>
    %145 = vector.extract_strided_slice %12 {offsets = [6, 0], sizes = [1, 256], strides = [1, 1]} : vector<8x256xf32> to vector<1x256xf32>
    %146 = vector.extract_strided_slice %20 {offsets = [6, 0], sizes = [1, 256], strides = [1, 1]} : vector<8x256xf32> to vector<1x256xf32>
    %147 = vector.extract_strided_slice %28 {offsets = [6, 0], sizes = [1, 256], strides = [1, 1]} : vector<8x256xf32> to vector<1x256xf32>
    %148 = vector.extract_strided_slice %36 {offsets = [6, 0], sizes = [1, 256], strides = [1, 1]} : vector<8x256xf32> to vector<1x256xf32>
    %149 = vector.extract_strided_slice %44 {offsets = [6, 0], sizes = [1, 256], strides = [1, 1]} : vector<8x256xf32> to vector<1x256xf32>
    %150 = vector.extract_strided_slice %52 {offsets = [6, 0], sizes = [1, 256], strides = [1, 1]} : vector<8x256xf32> to vector<1x256xf32>
    %151 = vector.extract_strided_slice %60 {offsets = [6, 0], sizes = [1, 256], strides = [1, 1]} : vector<8x256xf32> to vector<1x256xf32>
    %152 = vector.extract_strided_slice %68 {offsets = [6, 0], sizes = [1, 256], strides = [1, 1]} : vector<8x256xf32> to vector<1x256xf32>
    %153 = tpu.concatenate %145, %146, %147, %148, %149, %150, %151, %152 in 0 : vector<1x256xf32>, vector<1x256xf32>, vector<1x256xf32>, vector<1x256xf32>, vector<1x256xf32>, vector<1x256xf32>, vector<1x256xf32>, vector<1x256xf32> -> vector<8x256xf32>
    %c0_61 = arith.constant 0 : index
    %c1536 = arith.constant 1536 : index
    %154 = vector.load %arg3[%c0_61, %c1536] : memref<10x2048xf32, #tpu.memory_space<vmem>>, vector<10x256xf32>
    %cst_62 = arith.constant dense<0.000000e+00> : vector<8x10xf32>
    %155 = tpu.matmul %153, %154, %cst_62 {dimension_numbers = #tpu.dot_dimension_numbers<[1], [1], [0], [0], [0, 0, 1, 0], [], []>} : vector<8x256xf32>, vector<10x256xf32>, vector<8x10xf32> -> vector<8x10xf32>
    %156 = arith.addf %144, %155 : vector<8x10xf32>
    %157 = vector.extract_strided_slice %12 {offsets = [7, 0], sizes = [1, 256], strides = [1, 1]} : vector<8x256xf32> to vector<1x256xf32>
    %158 = vector.extract_strided_slice %20 {offsets = [7, 0], sizes = [1, 256], strides = [1, 1]} : vector<8x256xf32> to vector<1x256xf32>
    %159 = vector.extract_strided_slice %28 {offsets = [7, 0], sizes = [1, 256], strides = [1, 1]} : vector<8x256xf32> to vector<1x256xf32>
    %160 = vector.extract_strided_slice %36 {offsets = [7, 0], sizes = [1, 256], strides = [1, 1]} : vector<8x256xf32> to vector<1x256xf32>
    %161 = vector.extract_strided_slice %44 {offsets = [7, 0], sizes = [1, 256], strides = [1, 1]} : vector<8x256xf32> to vector<1x256xf32>
    %162 = vector.extract_strided_slice %52 {offsets = [7, 0], sizes = [1, 256], strides = [1, 1]} : vector<8x256xf32> to vector<1x256xf32>
    %163 = vector.extract_strided_slice %60 {offsets = [7, 0], sizes = [1, 256], strides = [1, 1]} : vector<8x256xf32> to vector<1x256xf32>
    %164 = vector.extract_strided_slice %68 {offsets = [7, 0], sizes = [1, 256], strides = [1, 1]} : vector<8x256xf32> to vector<1x256xf32>
    %165 = tpu.concatenate %157, %158, %159, %160, %161, %162, %163, %164 in 0 : vector<1x256xf32>, vector<1x256xf32>, vector<1x256xf32>, vector<1x256xf32>, vector<1x256xf32>, vector<1x256xf32>, vector<1x256xf32>, vector<1x256xf32> -> vector<8x256xf32>
    %c0_63 = arith.constant 0 : index
    %c1792 = arith.constant 1792 : index
    %166 = vector.load %arg3[%c0_63, %c1792] : memref<10x2048xf32, #tpu.memory_space<vmem>>, vector<10x256xf32>
    %cst_64 = arith.constant dense<0.000000e+00> : vector<8x10xf32>
    %167 = tpu.matmul %165, %166, %cst_64 {dimension_numbers = #tpu.dot_dimension_numbers<[1], [1], [0], [0], [0, 0, 1, 0], [], []>} : vector<8x256xf32>, vector<10x256xf32>, vector<8x10xf32> -> vector<8x10xf32>
    %168 = arith.addf %156, %167 : vector<8x10xf32>
    %c0_65 = arith.constant 0 : index
    %c0_66 = arith.constant 0 : index
    %169 = vector.load %arg4[%c0_65, %c0_66] : memref<1x10xf32, #tpu.memory_space<vmem>>, vector<1x10xf32>
    %170 = vector.broadcast %169 : vector<1x10xf32> to vector<8x10xf32>
    %171 = arith.addf %168, %170 : vector<8x10xf32>
    %c0_67 = arith.constant 0 : index
    %c0_68 = arith.constant 0 : index
    %172 = vector.load %arg7[%c0_67, %c0_68] : memref<8x10xf32, #tpu.memory_space<vmem>>, vector<8x10xf32>
    tpu.vector_store %arg7[%c0_67, %c0_68], %171 {strides = array<i32>} : memref<8x10xf32, #tpu.memory_space<vmem>>, vector<8x10xf32>,
    return
  }
}

</mosaic_0001>

<bundles_post_ra>
// kernel: _forward_impl.1
= control target key start
LH: loop header
LB: loop body
LE: loop exit
PB: predicated region body
PF: predicated region fallthrough
CT: control target
= control target key end

     0   :  { %v1959_v7 = vmov 0.0   ;;  %v1960_v13 = vmov 0   ;;  %vm115_vm0 = vcmask 1043456   ;;  %vm111_vm1 = vcmask 293888   ;;  %s2922_s0 = inlined_call_operand.vmem [shape: f32[36,2048], index: 0, kind: input, shape index: {}]   ;;  %s2923_s1 = inlined_call_operand.vmem [shape: f32[8,36], index: 1, kind: input, shape index: {}]   ;;  %s2924_s2 = inlined_call_operand.vmem [shape: f32[8,1], index: 2, kind: input, shape index: {}]   ;;  %s2925_s3 = inlined_call_operand.vmem [shape: f32[10,2048], index: 3, kind: input, shape index: {}]   ;;  %s2926_s4 = inlined_call_operand.vmem [shape: f32[1,10], index: 4, kind: input, shape index: {}]   ;;  %s2927_s5 = inlined_call_operand.vmem [shape: f32[8,8,256], index: 5, kind: output, shape index: {0}]   ;;  %s2928_s6 = inlined_call_operand.vmem [shape: f32[8,8,256], index: 6, kind: output, shape index: {1}]   ;;  %s2929_s7 = inlined_call_operand.hbm [shape: f32[8,10], index: 7, kind: output, shape index: {2}]  }
   0x1   :  { %v26_v0 = vld [vmem:[%s2922_s0 + $0x8] sm:$0xff]  ;;  %v28_v2 = vld [vmem:[%s2922_s0 + $0x18] sm:$0xff]  ;;  %v25_v5 = vld [vmem:[%s2922_s0] sm:$0xff]  ;;  %228 = vmatprep.mubr.f32.mxu0 %v1959_v7  ;;  %299 = vmatprep.mubr.f32.mxu1 %v1959_v7 }
   0x2   :  { %v42_v1 = vld [vmem:[%s2922_s0 + $0x88] sm:$0xff]  ;;  %v44_v4 = vld [vmem:[%s2922_s0 + $0x98] sm:$0xff]  ;;  %v41_v6 = vld [vmem:[%s2922_s0 + $0x80] sm:$0xff]  ;;  %1934 = vset.pattern.permute.xlu0 %v1960_v13 }
   0x3   :  { %v1835_v3 = vpack.c.bf16 %v42_v1, %v26_v0  ;;  %v1843_v8 = vpack.c.bf16 %v44_v4, %v28_v2  ;;  %v1837_v9 = vpack.c.bf16 %v41_v6, %v25_v5  ;;  %v27_v10 = vld [vmem:[%s2922_s0 + $0x10] sm:$0xff]  ;;  %v58_v12 = vld [vmem:[%s2922_s0 + $0x108] sm:$0xff]  ;;  %v60_v16 = vld [vmem:[%s2922_s0 + $0x118] sm:$0xff] }
   0x4   :  { %v43_v11 = vld [vmem:[%s2922_s0 + $0x90] sm:$0xff]  ;;  %v74_v15 = vld [vmem:[%s2922_s0 + $0x188] sm:$0xff]  ;;  %v76_v17 = vld [vmem:[%s2922_s0 + $0x198] sm:$0xff] }
   0x5   :  { %1836 = vmatprep.subr.bf16.mxu0 %v1835_v3  ;;  %v1845_v14 = vpack.c.bf16 %v43_v11, %v27_v10  ;;  %1844 = vmatprep.subr.bf16.mxu1 %v1843_v8  ;;  %v1839_v18 = vpack.c.bf16 %v74_v15, %v58_v12  ;;  %v1847_v19 = vpack.c.bf16 %v76_v17, %v60_v16  ;;  %v57_v20 = vld [vmem:[%s2922_s0 + $0x100] sm:$0xff]  ;;  %v59_v22 = vld [vmem:[%s2922_s0 + $0x110] sm:$0xff]  ;;  %v90_v26 = vld [vmem:[%s2922_s0 + $0x208] sm:$0xf] }
   0x6   :  { %1838 = vmatpush1.bf16.msra.mxu0 %v1837_v9  ;;  %v73_v21 = vld [vmem:[%s2922_s0 + $0x180] sm:$0xff]  ;;  %v75_v24 = vld [vmem:[%s2922_s0 + $0x190] sm:$0xff]  ;;  %v92_v27 = vld [vmem:[%s2922_s0 + $0x218] sm:$0xf] }
   0x7   :  { %1846 = vmatpush1.bf16.msra.mxu1 %v1845_v14  ;;  %v1841_v23 = vpack.c.bf16 %v73_v21, %v57_v20  ;;  %1840 = vmatprep.subr.bf16.mxu0 %v1839_v18  ;;  %v1849_v25 = vpack.c.bf16 %v75_v24, %v59_v22  ;;  %v89_v28 = vld [vmem:[%s2922_s0 + $0x200] sm:$0xf]  ;;  %v30_v29 = vld [vmem:[%s2922_s0 + $0x28] sm:$0xff]  ;;  %v32_v31 = vld [vmem:[%s2922_s0 + $0x38] sm:$0xff] }
   0x8   :  { %1848 = vmatprep.subr.bf16.mxu1 %v1847_v19  ;;  %v46_v30 = vld [vmem:[%s2922_s0 + $0xa8] sm:$0xff]  ;;  %v91_v32 = vld [vmem:[%s2922_s0 + $0x210] sm:$0xf]  ;;  %v2076_v33 = vld [vmem:[%s2923_s1] sm:$0xff] }
   0x9   :  { %v48_v34 = vld [vmem:[%s2922_s0 + $0xb8] sm:$0xff]  ;;  %v29_v35 = vld [vmem:[%s2922_s0 + $0x20] sm:$0xff]  ;;  %v31_v37 = vld [vmem:[%s2922_s0 + $0x30] sm:$0xff]  ;;  %v1851_v40 = vpack.c.bf16 %v46_v30, %v30_v29 }
   0xa   :  { %1842 = vmatpush1.bf16.msra.mxu0 %v1841_v23  ;;  %v45_v36 = vld [vmem:[%s2922_s0 + $0xa0] sm:$0xff]  ;;  %v47_v38 = vld [vmem:[%s2922_s0 + $0xb0] sm:$0xff]  ;;  %v62_v39 = vld [vmem:[%s2922_s0 + $0x128] sm:$0xff]  ;;  %v1859_v44 = vpack.c.bf16 %v48_v34, %v32_v31 }
   0xb   :  { %1850 = vmatpush1.bf16.msra.mxu1 %v1849_v25  ;;  %1782 = vmatprep.subr.msk.mxu0 %vm115_vm0, %v90_v26  ;;  %v78_v41 = vld [vmem:[%s2922_s0 + $0x1a8] sm:$0xff]  ;;  %v64_v42 = vld [vmem:[%s2922_s0 + $0x138] sm:$0xff]  ;;  %v1853_v45 = vpack.c.bf16 %v45_v36, %v29_v35  ;;  %v1861_v46 = vpack.c.bf16 %v47_v38, %v31_v37  ;;  %v61_v48 = vld [vmem:[%s2922_s0 + $0x120] sm:$0xff] }
   0xc   :  { %1785 = vmatprep.subr.msk.mxu1 %vm115_vm0, %v92_v27  ;;  %v80_v43 = vld [vmem:[%s2922_s0 + $0x1b8] sm:$0xff]  ;;  %v1855_v47 = vpack.c.bf16 %v78_v41, %v62_v39  ;;  %v77_v49 = vld [vmem:[%s2922_s0 + $0x1a0] sm:$0xff]  ;;  %v63_v51 = vld [vmem:[%s2922_s0 + $0x130] sm:$0xff] }
   0xd   :  { %v1863_v50 = vpack.c.bf16 %v80_v43, %v64_v42  ;;  %v79_v52 = vld [vmem:[%s2922_s0 + $0x1b0] sm:$0xff]  ;;  %v1857_v53 = vpack.c.bf16 %v77_v49, %v61_v48  ;;  %v94_v55 = vld [vmem:[%s2922_s0 + $0x228] sm:$0xf]  ;;  %v96_v56 = vld [vmem:[%s2922_s0 + $0x238] sm:$0xf] }
   0xe   :  { %1783 = vmatpush1.msk.msra.mxu0 %vm115_vm0, %v89_v28  ;;  %v1865_v54 = vpack.c.bf16 %v79_v52, %v63_v51  ;;  %v34_v57 = vld [vmem:[%s2922_s0 + $0x48] sm:$0xff]  ;;  %v93_v58 = vld [vmem:[%s2922_s0 + $0x220] sm:$0xf]  ;;  %v36_v60 = vld [vmem:[%s2922_s0 + $0x58] sm:$0xff] }
   0xf   :  { %1786 = vmatpush1.msk.msra.mxu1 %vm115_vm0, %v91_v32  ;;  %1784 = vmatmul.mubr.msk.f32.vlgmr.msra.gmra.mrb[0].mxu0 %vm111_vm1, %v2076_v33  ;;  %v50_v59 = vld [vmem:[%s2922_s0 + $0xc8] sm:$0xff]  ;;  %v52_v61 = vld [vmem:[%s2922_s0 + $0xd8] sm:$0xff]  ;;  %v33_v62 = vld [vmem:[%s2922_s0 + $0x40] sm:$0xff] }
  0x10   :  { %1787 = vmatmul.mubr.msk.f32.vlgmr.msra.gmra.mrb[0].mxu1 %vm111_vm1, %v2076_v33  ;;  %1852 = vmatprep.subr.bf16.mxu0 %v1851_v40  ;;  %v49_v63 = vld [vmem:[%s2922_s0 + $0xc0] sm:$0xff]  ;;  %v35_v0 = vld [vmem:[%s2922_s0 + $0x50] sm:$0xff]  ;;  %v66_v2 = vld [vmem:[%s2922_s0 + $0x148] sm:$0xff]  ;;  %v1867_v5 = vpack.c.bf16 %v50_v59, %v34_v57  ;;  %v1875_v9 = vpack.c.bf16 %v52_v61, %v36_v60 }
  0x11   :  { %1860 = vmatprep.subr.bf16.mxu1 %v1859_v44  ;;  %1854 = vmatpush1.bf16.msra.mxu0 %v1853_v45  ;;  %v51_v1 = vld [vmem:[%s2922_s0 + $0xd0] sm:$0xff]  ;;  %v82_v3 = vld [vmem:[%s2922_s0 + $0x1c8] sm:$0xff]  ;;  %v68_v6 = vld [vmem:[%s2922_s0 + $0x158] sm:$0xff]  ;;  %v1869_v10 = vpack.c.bf16 %v49_v63, %v33_v62 }
  0x12   :  { %1862 = vmatpush1.bf16.msra.mxu1 %v1861_v46  ;;  %1856 = vmatprep.subr.bf16.mxu0 %v1855_v47  ;;  %v95_v4 = vld [vmem:[%s2922_s0 + $0x230] sm:$0xf]  ;;  %v84_v8 = vld [vmem:[%s2922_s0 + $0x1d8] sm:$0xff]  ;;  %v1877_v11 = vpack.c.bf16 %v51_v1, %v35_v0  ;;  %v1871_v12 = vpack.c.bf16 %v82_v3, %v66_v2  ;;  %v65_v13 = vld [vmem:[%s2922_s0 + $0x140] sm:$0xff] }
  0x13   :  { %1864 = vmatprep.subr.bf16.mxu1 %v1863_v50  ;;  %370 = vmatprep.mubr.f32.mxu0 %v1959_v7  ;;  %v81_v14 = vld [vmem:[%s2922_s0 + $0x1c0] sm:$0xff]  ;;  %v1879_v15 = vpack.c.bf16 %v84_v8, %v68_v6  ;;  %v67_v16 = vld [vmem:[%s2922_s0 + $0x150] sm:$0xff] }
  0x14   :  { %441 = vmatprep.mubr.f32.mxu1 %v1959_v7  ;;  %v83_v17 = vld [vmem:[%s2922_s0 + $0x1d0] sm:$0xff]  ;;  %v1873_v18 = vpack.c.bf16 %v81_v14, %v65_v13  ;;  %v105_v20 = vld [vmem:[%s2924_s2] sm:$0xff] }
  0x15   :  { %1858 = vmatpush1.bf16.msra.mxu0 %v1857_v53  ;;  %v1881_v19 = vpack.c.bf16 %v83_v17, %v67_v16 }
  0x16   :  { %1866 = vmatpush1.bf16.msra.mxu1 %v1865_v54  ;;  %1788 = vmatprep.subr.msk.mxu0 %vm115_vm0, %v94_v55 }
  0x17   :  { %1791 = vmatprep.subr.msk.mxu1 %vm115_vm0, %v96_v56 }
  0x19   :  { %1789 = vmatpush1.msk.msra.mxu0 %vm115_vm0, %v93_v58 }
  0x1a   :  { %1792 = vmatpush1.msk.msra.mxu1 %vm115_vm0, %v95_v4  ;;  %1790 = vmatmul.mubr.msk.f32.vlgmr.msra.gmra.mrb[2].mxu0 %vm111_vm1, %v2076_v33 }
  0x1b   :  { %1793 = vmatmul.mubr.msk.f32.vlgmr.msra.gmra.mrb[2].mxu1 %vm111_vm1, %v2076_v33  ;;  %1868 = vmatprep.subr.bf16.mxu0 %v1867_v5 }
  0x1c   :  { %1876 = vmatprep.subr.bf16.mxu1 %v1875_v9  ;;  %1870 = vmatpush1.bf16.msra.mxu0 %v1869_v10 }
  0x1d   :  { %1878 = vmatpush1.bf16.msra.mxu1 %v1877_v11  ;;  %1872 = vmatprep.subr.bf16.mxu0 %v1871_v12 }
  0x1e   :  { %13 = vsyncpa [#allocation3], 0  ;;  %1880 = vmatprep.subr.bf16.mxu1 %v1879_v15  ;;  %v98_v21 = vld [vmem:[%s2922_s0 + $0x248] sm:$0xf]  ;;  %v100_v22 = vld [vmem:[%s2922_s0 + $0x258] sm:$0xf]  ;;  %512 = vmatprep.mubr.f32.mxu0 %v1959_v7 }
  0x1f   :  { %v38_v23 = vld [vmem:[%s2922_s0 + $0x68] sm:$0xff]  ;;  %v97_v24 = vld [vmem:[%s2922_s0 + $0x240] sm:$0xf]  ;;  %583 = vmatprep.mubr.f32.mxu1 %v1959_v7  ;;  %v40_v26 = vld [vmem:[%s2922_s0 + $0x78] sm:$0xff]  ;;  %108 = vperm.xlu0 %1934, %v105_v20   ;;  %vm836_vm2 = vcmask 1040384   ;;  %vm839_vm3 = vcmask 1041408  }
  0x20   :  { %v54_v25 = vld [vmem:[%s2922_s0 + $0xe8] sm:$0xff]  ;;  %v56_v27 = vld [vmem:[%s2922_s0 + $0xf8] sm:$0xff]  ;;  %1874 = vmatpush1.bf16.msra.mxu0 %v1873_v18  ;;  %v37_v28 = vld [vmem:[%s2922_s0 + $0x60] sm:$0xff]  ;;  %vm842_vm4 = vcmask 1042432   ;;  %vm847_vm5 = vcmask 1044480   ;;  %vm853_vm6 = vcmask 1046528  }
  0x21   :  { %v53_v29 = vld [vmem:[%s2922_s0 + $0xe0] sm:$0xff]  ;;  %v39_v30 = vld [vmem:[%s2922_s0 + $0x70] sm:$0xff]  ;;  %1882 = vmatpush1.bf16.msra.mxu1 %v1881_v19  ;;  %1794 = vmatprep.subr.msk.mxu0 %vm115_vm0, %v98_v21  ;;  %v70_v32 = vld [vmem:[%s2922_s0 + $0x168] sm:$0xff]  ;;  %v1883_v36 = vpack.c.bf16 %v54_v25, %v38_v23  ;;  %v1891_v39 = vpack.c.bf16 %v56_v27, %v40_v26  ;;  %vm850_vm7 = vcmask 1045504   ;;  %s1961_s15 = smov [#allocation2]   ;;  %vm1758_vm8 = vcmask 80896  }
  0x22   :  { %v55_v31 = vld [vmem:[%s2922_s0 + $0xf0] sm:$0xff]  ;;  %v86_v34 = vld [vmem:[%s2922_s0 + $0x1e8] sm:$0xff]  ;;  %1797 = vmatprep.subr.msk.mxu1 %vm115_vm0, %v100_v22  ;;  %v72_v37 = vld [vmem:[%s2922_s0 + $0x178] sm:$0xff]  ;;  %v1885_v40 = vpack.c.bf16 %v53_v29, %v37_v28  ;;  %s1770_s16 = sshll.u32 %s1961_s15, 4  ;;  %s1771_s16 = int_to_ptr.vmem [resolvable:$true] %s1770_s16 }
  0x23   :  { %v99_v35 = vld [vmem:[%s2922_s0 + $0x250] sm:$0xf]  ;;  %v88_v38 = vld [vmem:[%s2922_s0 + $0x1f8] sm:$0xff]  ;;  %v1893_v41 = vpack.c.bf16 %v55_v31, %v39_v30  ;;  %v1887_v42 = vpack.c.bf16 %v86_v34, %v70_v32  ;;  %v69_v43 = vld [vmem:[%s2922_s0 + $0x160] sm:$0xff]  ;;  %s1935_s17 = scalar_lea.vmem %s1771_s16, 128  ;;  %p1940_p1 = scmp.lt.s32.totalorder %s1771_s16, %s1771_s16 }
  0x24   :  { %1795 = vmatpush1.msk.msra.mxu0 %vm115_vm0, %v97_v24  ;;  %v85_v44 = vld [vmem:[%s2922_s0 + $0x1e0] sm:$0xff]  ;;  %v1895_v45 = vpack.c.bf16 %v88_v38, %v72_v37  ;;  %v71_v46 = vld [vmem:[%s2922_s0 + $0x170] sm:$0xff]  ;;  %v102_v50 = vld [vmem:[%s2922_s0 + $0x268] sm:$0xf]  ;;  %p1936_p0 = scmp.ne.s32.totalorder %s1771_s16, %s1935_s17  ;;  %p1941_p2 = scmp.lt.s32.totalorder %s1935_s17, %s1935_s17 }
  0x25   :  { %1798 = vmatpush1.msk.msra.mxu1 %vm115_vm0, %v99_v35  ;;  %1796 = vmatmul.mubr.msk.f32.vlgmr.msra.gmra.mrb[4].mxu0 %vm111_vm1, %v2076_v33  ;;  %v87_v47 = vld [vmem:[%s2922_s0 + $0x1f0] sm:$0xff]  ;;  %v1889_v48 = vpack.c.bf16 %v85_v44, %v69_v43  ;;  %v104_v51 = vld [vmem:[%s2922_s0 + $0x278] sm:$0xf]  ;;  %v101_v52 = vld [vmem:[%s2922_s0 + $0x260] sm:$0xf] }
  0x26   :  { %1799 = vmatmul.mubr.msk.f32.vlgmr.msra.gmra.mrb[4].mxu1 %vm111_vm1, %v2076_v33  ;;  %1884 = vmatprep.subr.bf16.mxu0 %v1883_v36  ;;  %v1897_v49 = vpack.c.bf16 %v87_v47, %v71_v46  ;;  %v103_v53 = vld [vmem:[%s2922_s0 + $0x270] sm:$0xf]  ;;  %v907_v54 = vld [vmem:[%s2925_s3 + $0x98] sm:$0x3]  ;;  %v857_v55 = vld [vmem:[%s2925_s3 + $0x8] sm:$0xff]  ;;  %p1942_p3 = por %p1941_p2, %p1940_p1 }
  0x27   :  { %1892 = vmatprep.subr.bf16.mxu1 %v1891_v39  ;;  %1886 = vmatpush1.bf16.msra.mxu0 %v1885_v40  ;;  %v859_v57 = vld [vmem:[%s2925_s3 + $0x88] sm:$0x3]  ;;  %v906_v58 = vld [vmem:[%s2925_s3 + $0x90] sm:$0x3]  ;;  %v856_v61 = vld [vmem:[%s2925_s3] sm:$0xff] }
  0x28   :  { %1894 = vmatpush1.bf16.msra.mxu1 %v1893_v41  ;;  %1888 = vmatprep.subr.bf16.mxu0 %v1887_v42  ;;  %v1903_v59 = vpack.c.bf16 %v859_v57, %v857_v55  ;;  %v858_v62 = vld [vmem:[%s2925_s3 + $0x80] sm:$0x3]  ;;  %v1091_v0 = vld [vmem:[%s2925_s3 + $0x28] sm:$0xff]  ;;  %v1208_v2 = vld [vmem:[%s2925_s3 + $0x38] sm:$0xff]  ;;  %p1943_p4 = pnand %p1942_p3, %p1936_p0 }
  0x29   :  { %1896 = vmatprep.subr.bf16.mxu1 %v1895_v45  ;;  %654 = vmatprep.mubr.f32.mxu0 %v1959_v7  ;;  %v1905_v63 = vpack.c.bf16 %v858_v62, %v856_v61  ;;  %v1093_v1 = vld [vmem:[%s2925_s3 + $0xa8] sm:$0x3]  ;;  %v1210_v4 = vld [vmem:[%s2925_s3 + $0xb8] sm:$0x3]  ;;  %v2329_v6 = vld [vmem:[%s2925_s3 + $0x20] sm:$0xff] }
  0x2a   :  { %725 = vmatprep.mubr.f32.mxu1 %v1959_v7  ;;  %v905_v7 = vld [vmem:[%s2925_s3 + $0x18] sm:$0xff]  ;;  %v1907_v3 = vpack.c.bf16 %v1093_v1, %v1091_v0  ;;  %v1911_v5 = vpack.c.bf16 %v1210_v4, %v1208_v2  ;;  %v2334_v8 = vld [vmem:[%s2925_s3 + $0xa0] sm:$0x3]  ;;  %v2339_v9 = vld [vmem:[%s2925_s3 + $0x30] sm:$0xff] }
  0x2b   :  { %1890 = vmatpush1.bf16.msra.mxu0 %v1889_v48  ;;  %v1899_v56 = vpack.c.bf16 %v907_v54, %v905_v7  ;;  %v2344_v10 = vld [vmem:[%s2925_s3 + $0xb0] sm:$0x3]  ;;  %v2349_v11 = vld [vmem:[%s2925_s3 + $0x48] sm:$0xff]  ;;  %v2359_v13 = vld [vmem:[%s2925_s3 + $0x58] sm:$0xff] }
  0x2c   :  { %1898 = vmatpush1.bf16.msra.mxu1 %v1897_v49  ;;  %1800 = vmatprep.subr.msk.mxu0 %vm115_vm0, %v102_v50  ;;  %v2354_v12 = vld [vmem:[%s2925_s3 + $0xc8] sm:$0x3]  ;;  %v2364_v14 = vld [vmem:[%s2925_s3 + $0xd8] sm:$0x3]  ;;  %v2371_v16 = vld [vmem:[%s2925_s3 + $0x40] sm:$0xff] }
  0x2d   :  { %1803 = vmatprep.subr.msk.mxu1 %vm115_vm0, %v104_v51  ;;  %v2376_v17 = vld [vmem:[%s2925_s3 + $0xc0] sm:$0x3]  ;;  %v2381_v18 = vld [vmem:[%s2925_s3 + $0x50] sm:$0xff]  ;;  %v2391_v20 = vld [vmem:[%s2925_s3 + $0x68] sm:$0xff] }
  0x2e   :  { %v2386_v19 = vld [vmem:[%s2925_s3 + $0xd0] sm:$0x3]  ;;  %v2396_v21 = vld [vmem:[%s2925_s3 + $0xe8] sm:$0x3]  ;;  %v2403_v24 = vld [vmem:[%s2925_s3 + $0x78] sm:$0xff] }
  0x2f   :  { %1801 = vmatpush1.msk.msra.mxu0 %vm115_vm0, %v101_v52  ;;  %v2408_v25 = vld [vmem:[%s2925_s3 + $0xf8] sm:$0x3]  ;;  %v2413_v26 = vld [vmem:[%s2925_s3 + $0xe0] sm:$0x3]  ;;  %v2430_v35 = vld [vmem:[%s2925_s3 + $0x70] sm:$0xff] }
  0x30   :  { %1804 = vmatpush1.msk.msra.mxu1 %vm115_vm0, %v103_v53  ;;  %1802 = vmatmul.mubr.msk.f32.vlgmr.msra.gmra.mrb[6].mxu0 %vm111_vm1, %v2076_v33  ;;  %2934 = vst [vmem:[#allocation5_spill] sm:$0xff] %v2413_v26  ;;  %v2425_v34 = vld [vmem:[%s2925_s3 + $0x60] sm:$0xff]  ;;  %2936 = vst [vmem:[#allocation7_spill] sm:$0xff] %v2430_v35  ;;  %v2435_v36 = vld [vmem:[%s2925_s3 + $0xf0] sm:$0x3] }
  0x31   :  { %1805 = vmatmul.mubr.msk.f32.vlgmr.msra.gmra.mrb[6].mxu1 %vm111_vm1, %v2076_v33  ;;  %v904_v33 = vld [vmem:[%s2925_s3 + $0x10] sm:$0xff]  ;;  %1900 = vmatprep.subr.bf16.mxu0 %v1899_v56  ;;  %2935 = vst [vmem:[#allocation6_spill] sm:$0xff] %v2425_v34  ;;  %2937 = vst [vmem:[#allocation8_spill] sm:$0xff] %v2435_v36 }
  0x32   :  { %v1901_v60 = vpack.c.bf16 %v906_v58, %v904_v33  ;;  %1904 = vmatprep.subr.bf16.mxu1 %v1903_v59 }
  0x36   :  { %1902 = vmatpush1.bf16.xpose.msra.mxu0 %v1901_v60 }
  0x37   :  { %1906 = vmatpush1.bf16.xpose.msra.mxu1 %v1905_v63  ;;  %1908 = vmatprep.subr.bf16.mxu0 %v1907_v3 }
  0x38   :  { %1912 = vmatprep.subr.bf16.mxu1 %v1911_v5 }
  0x9e   :  { %v2366_v15 = vpop.permute.xlu0 %108 }
  0xe2   :  { %v230_v22 = vpop.f32.mrb[0].mxu0 }
  0xe3   :  { %v231_v27 = vadd.f32 %v230_v22, %v2366_v15  ;;  %v301_v28 = vpop.f32.mrb[0].mxu1  ;;  %v232_v29 = vpop.f32.mrb[1].mxu0 }
  0xe4   :  { %v302_v37 = vadd.f32 %v301_v28, %v2366_v15  ;;  %v233_v38 = vadd.f32 %v232_v29, %v2366_v15  ;;  %v303_v39 = vpop.f32.mrb[1].mxu1 }
  0xe5   :  { %v2443_v42 = vmax.f32 %v231_v27, 0.0  ;;  %748 = vst [vmem:[%s2927_s5] sm:$0xff] %v231_v27  ;;  %v304_v43 = vadd.f32 %v303_v39, %v2366_v15 }
  0xe6   :  { %v2453_v46 = vmax.f32 %v302_v37, 0.0  ;;  %1806 = vst [vmem:[%s2927_s5 + $0x10] sm:$0xff] %v302_v37  ;;  %v2458_v47 = vmax.f32 %v233_v38, 0.0  ;;  %749 = vst [vmem:[%s2927_s5 + $0x8] sm:$0xff] %v233_v38 }
  0xe7   :  { %750 = vst [vmem:[%s2928_s6] sm:$0xff] %v2443_v42  ;;  %v2471_v50 = vmax.f32 %v304_v43, 0.0  ;;  %1807 = vst [vmem:[%s2927_s5 + $0x18] sm:$0xff] %v304_v43  ;;  %v862_v51 = vrot.slane %v2443_v42, 1  ;;  %v1048_v52 = vrot.slane %v2443_v42, 2  ;;  %v1165_v53 = vrot.slane %v2443_v42, 3 }
  0xe8   :  { %1808 = vst [vmem:[%s2928_s6 + $0x10] sm:$0xff] %v2453_v46  ;;  %751 = vst [vmem:[%s2928_s6 + $0x8] sm:$0xff] %v2458_v47  ;;  %v863_v7 = vrot.slane %v2458_v47, 1  ;;  %v796_v54 = vrot.slane %v2453_v46, 7  ;;  %v1049_v55 = vrot.slane %v2458_v47, 2  ;;  %v1166_v56 = vrot.slane %v2458_v47, 3 }
  0xe9   :  { %1809 = vst [vmem:[%s2928_s6 + $0x18] sm:$0xff] %v2471_v50  ;;  %v797_v57 = vrot.slane %v2471_v50, 7  ;;  %v890_v33 = vsel %vm836_vm2, %v862_v51, %v2453_v46  ;;  %v1053_v58 = vrot.slane %v2471_v50, 1  ;;  %v1170_v59 = vrot.slane %v2471_v50, 2 }
  0xea   :  { %v891_v60 = vsel %vm836_vm2, %v863_v7, %v2471_v50  ;;  %v837_v61 = vsel %vm836_vm2, %v2443_v42, %v796_v54  ;;  %v1052_v62 = vrot.slane %v2453_v46, 1  ;;  %v1169_v63 = vrot.slane %v2453_v46, 2 }
  0xeb   :  { %v838_v0 = vsel %vm836_vm2, %v2458_v47, %v797_v57  ;;  %v1077_v1 = vsel %vm836_vm2, %v1049_v55, %v1053_v58  ;;  %v2510_v2 = vsel %vm836_vm2, %v1166_v56, %v1170_v59  ;;  %v1283_v3 = vrot.slane %v2458_v47, 4 }
  0xec   :  { %v1076_v4 = vsel %vm836_vm2, %v1048_v52, %v1052_v62  ;;  %v2515_v5 = vsel %vm836_vm2, %v1165_v53, %v1169_v63  ;;  %v1287_v22 = vrot.slane %v2471_v50, 3  ;;  %v1400_v27 = vrot.slane %v2458_v47, 5 }
  0xed   :  { %v372_v28 = vpop.f32.mrb[2].mxu0  ;;  %v1404_v29 = vrot.slane %v2471_v50, 4  ;;  %v1282_v37 = vrot.slane %v2443_v42, 4  ;;  %v1286_v38 = vrot.slane %v2453_v46, 3  ;;  %v1399_v39 = vrot.slane %v2443_v42, 5 }
  0xee   :  { %v373_v43 = vadd.f32 %v372_v28, %v2366_v15  ;;  %v443_v51 = vpop.f32.mrb[2].mxu1  ;;  %v374_v52 = vpop.f32.mrb[3].mxu0  ;;  %v2525_v53 = vsel %vm836_vm2, %v1283_v3, %v1287_v22  ;;  %v1403_v7 = vrot.slane %v2453_v46, 4 }
  0xef   :  { %v444_v55 = vadd.f32 %v443_v51, %v2366_v15  ;;  %v375_v56 = vadd.f32 %v374_v52, %v2366_v15  ;;  %v445_v57 = vpop.f32.mrb[3].mxu1  ;;  %v2532_v58 = vsel %vm836_vm2, %v1400_v27, %v1404_v29  ;;  %v2535_v59 = vsel %vm836_vm2, %v1282_v37, %v1286_v38 }
  0xf0   :  { %v2537_v62 = vmax.f32 %v373_v43, 0.0  ;;  %1810 = vst [vmem:[%s2927_s5 + $0x20] sm:$0xff] %v373_v43  ;;  %v446_v63 = vadd.f32 %v445_v57, %v2366_v15  ;;  %v2544_v3 = vsel %vm836_vm2, %v1399_v39, %v1403_v7 }
  0xf1   :  { %v2547_v28 = vmax.f32 %v444_v55, 0.0  ;;  %1814 = vst [vmem:[%s2927_s5 + $0x30] sm:$0xff] %v444_v55  ;;  %v2552_v27 = vmax.f32 %v375_v56, 0.0  ;;  %1811 = vst [vmem:[%s2927_s5 + $0x28] sm:$0xff] %v375_v56 }
  0xf2   :  { %1812 = vst [vmem:[%s2928_s6 + $0x20] sm:$0xff] %v2537_v62  ;;  %v2563_v38 = vmax.f32 %v446_v63, 0.0  ;;  %1815 = vst [vmem:[%s2927_s5 + $0x38] sm:$0xff] %v446_v63  ;;  %v866_v39 = vrot.slane %v2537_v62, 7  ;;  %v802_v43 = vrot.slane %v2537_v62, 6  ;;  %v1078_v51 = vsel %vm839_vm3, %v1076_v4, %v2537_v62 }
  0xf3   :  { %1816 = vst [vmem:[%s2928_s6 + $0x30] sm:$0xff] %v2547_v28  ;;  %1813 = vst [vmem:[%s2928_s6 + $0x28] sm:$0xff] %v2552_v27  ;;  %v867_v52 = vrot.slane %v2552_v27, 7  ;;  %v803_v7 = vrot.slane %v2552_v27, 6  ;;  %v870_v55 = vrot.slane %v2547_v28, 6  ;;  %v808_v56 = vrot.slane %v2547_v28, 5 }
  0xf4   :  { %1817 = vst [vmem:[%s2928_s6 + $0x38] sm:$0xff] %v2563_v38  ;;  %v871_v4 = vrot.slane %v2563_v38, 6  ;;  %v809_v57 = vrot.slane %v2563_v38, 5  ;;  %v892_v63 = vsel %vm839_vm3, %v890_v33, %v866_v39  ;;  %v840_v49 = vsel %vm839_vm3, %v837_v61, %v802_v43 }
  0xf5   :  { %v893_v48 = vsel %vm839_vm3, %v891_v60, %v867_v52  ;;  %v841_v29 = vsel %vm839_vm3, %v838_v0, %v803_v7  ;;  %v894_v37 = vsel %vm842_vm4, %v892_v63, %v870_v55  ;;  %v843_v45 = vsel %vm842_vm4, %v840_v49, %v808_v56 }
  0xf6   :  { %v895_v44 = vsel %vm842_vm4, %v893_v48, %v871_v4  ;;  %v844_v54 = vsel %vm842_vm4, %v841_v29, %v809_v57  ;;  %v1057_v22 = vrot.slane %v2563_v38, 7  ;;  %v1079_v33 = vsel %vm839_vm3, %v1077_v1, %v2552_v27 }
  0xf7   :  { %v1174_v61 = vrot.slane %v2552_v27, 1  ;;  %v1056_v39 = vrot.slane %v2547_v28, 7  ;;  %v1173_v60 = vrot.slane %v2537_v62, 1  ;;  %v1291_v0 = vrot.slane %v2552_v27, 2 }
  0xf8   :  { %v514_v43 = vpop.f32.mrb[4].mxu0  ;;  %v1081_v49 = vsel %vm842_vm4, %v1079_v33, %v1057_v22  ;;  %v1295_v48 = vrot.slane %v2563_v38, 1  ;;  %v1408_v29 = vrot.slane %v2552_v27, 3  ;;  %v1412_v52 = vrot.slane %v2563_v38, 2 }
  0xf9   :  { %v515_v7 = vadd.f32 %v514_v43, %v2366_v15  ;;  %v585_v1 = vpop.f32.mrb[4].mxu1  ;;  %v516_v55 = vpop.f32.mrb[5].mxu0  ;;  %v1196_v56 = vsel %vm839_vm3, %v2510_v2, %v1174_v61  ;;  %v1080_v4 = vsel %vm842_vm4, %v1078_v51, %v1056_v39  ;;  %v1195_v57 = vsel %vm839_vm3, %v2515_v5, %v1173_v60 }
  0xfa   :  { %v586_v22 = vadd.f32 %v585_v1, %v2366_v15  ;;  %v517_v63 = vadd.f32 %v516_v55, %v2366_v15  ;;  %v587_v33 = vpop.f32.mrb[5].mxu1  ;;  %v1198_v41 = vsel %vm842_vm4, %v1196_v56, %v2563_v38  ;;  %v1197_v43 = vsel %vm842_vm4, %v1195_v57, %v2547_v28 }
  0xfb   :  { %v2621_v40 = vmax.f32 %v515_v7, 0.0  ;;  %1818 = vst [vmem:[%s2927_s5 + $0x40] sm:$0xff] %v515_v7  ;;  %v588_v2 = vadd.f32 %v587_v33, %v2366_v15  ;;  %v1313_v5 = vsel %vm839_vm3, %v2525_v53, %v1291_v0  ;;  %v1430_v51 = vsel %vm839_vm3, %v2532_v58, %v1408_v29 }
  0xfc   :  { %v2631_v61 = vmax.f32 %v586_v22, 0.0  ;;  %1822 = vst [vmem:[%s2927_s5 + $0x50] sm:$0xff] %v586_v22  ;;  %v2636_v39 = vmax.f32 %v517_v63, 0.0  ;;  %1819 = vst [vmem:[%s2927_s5 + $0x48] sm:$0xff] %v517_v63  ;;  %v1315_v60 = vsel %vm842_vm4, %v1313_v5, %v1295_v48  ;;  %v2643_v7 = vsel %vm842_vm4, %v1430_v51, %v1412_v52 }
  0xfd   :  { %1820 = vst [vmem:[%s2928_s6 + $0x40] sm:$0xff] %v2621_v40  ;;  %v2649_v53 = vmax.f32 %v588_v2, 0.0  ;;  %1823 = vst [vmem:[%s2927_s5 + $0x58] sm:$0xff] %v588_v2  ;;  %v874_v58 = vrot.slane %v2621_v40, 5  ;;  %v814_v0 = vrot.slane %v2621_v40, 4  ;;  %v1060_v48 = vrot.slane %v2621_v40, 6 }
  0xfe   :  { %1824 = vst [vmem:[%s2928_s6 + $0x50] sm:$0xff] %v2631_v61  ;;  %1821 = vst [vmem:[%s2928_s6 + $0x48] sm:$0xff] %v2636_v39  ;;  %v875_v29 = vrot.slane %v2636_v39, 5  ;;  %v815_v52 = vrot.slane %v2636_v39, 4  ;;  %v878_v1 = vrot.slane %v2631_v61, 4  ;;  %v820_v55 = vrot.slane %v2631_v61, 3 }
  0xff   :  { %1825 = vst [vmem:[%s2928_s6 + $0x58] sm:$0xff] %v2649_v53  ;;  %v879_v56 = vrot.slane %v2649_v53, 4  ;;  %v821_v57 = vrot.slane %v2649_v53, 3  ;;  %v896_v22 = vsel %vm115_vm0, %v894_v37, %v874_v58  ;;  %v845_v63 = vsel %vm115_vm0, %v843_v45, %v814_v0 }
 0x100   :  { %v897_v33 = vsel %vm115_vm0, %v895_v44, %v875_v29  ;;  %v846_v2 = vsel %vm115_vm0, %v844_v54, %v815_v52  ;;  %v898_v5 = vsel %vm847_vm5, %v896_v22, %v878_v1  ;;  %v848_v51 = vsel %vm847_vm5, %v845_v63, %v820_v55 }
 0x101   :  { %v899_v32 = vsel %vm847_vm5, %v897_v33, %v879_v56  ;;  %v849_v31 = vsel %vm847_vm5, %v846_v2, %v821_v57  ;;  %v1061_v30 = vrot.slane %v2636_v39, 6  ;;  %v1065_v37 = vrot.slane %v2649_v53, 5 }
 0x102   :  { %v1178_v45 = vrot.slane %v2636_v39, 7  ;;  %v1182_v58 = vrot.slane %v2649_v53, 6  ;;  %v1064_v44 = vrot.slane %v2631_v61, 5  ;;  %v1082_v54 = vsel %vm115_vm0, %v1080_v4, %v1060_v48 }
 0x103   :  { %v656_v0 = vpop.f32.mrb[6].mxu0  ;;  %v1083_v29 = vsel %vm115_vm0, %v1081_v49, %v1061_v30  ;;  %v1177_v52 = vrot.slane %v2621_v40, 7  ;;  %v1181_v1 = vrot.slane %v2631_v61, 6  ;;  %v1299_v55 = vrot.slane %v2649_v53, 7 }
 0x104   :  { %v657_v56 = vadd.f32 %v656_v0, %v2366_v15  ;;  %v727_v57 = vpop.f32.mrb[6].mxu1  ;;  %v658_v22 = vpop.f32.mrb[7].mxu0  ;;  %v1085_v63 = vsel %vm847_vm5, %v1083_v29, %v1065_v37  ;;  %v1200_v33 = vsel %vm115_vm0, %v1198_v41, %v1178_v45  ;;  %v1084_v2 = vsel %vm847_vm5, %v1082_v54, %v1064_v44 }
 0x105   :  { %v728_v4 = vadd.f32 %v727_v57, %v2366_v15  ;;  %v659_v30 = vadd.f32 %v658_v22, %v2366_v15  ;;  %v729_v49 = vpop.f32.mrb[7].mxu1  ;;  %v1202_v48 = vsel %vm847_vm5, %v1200_v33, %v1182_v58  ;;  %v1199_v23 = vsel %vm115_vm0, %v1197_v43, %v1177_v52 }
 0x106   :  { %v2701_v35 = vmax.f32 %v657_v56, 0.0  ;;  %1826 = vst [vmem:[%s2927_s5 + $0x60] sm:$0xff] %v657_v56  ;;  %v730_v37 = vadd.f32 %v729_v49, %v2366_v15  ;;  %v1201_v41 = vsel %vm847_vm5, %v1199_v23, %v1181_v1  ;;  %v1317_v45 = vsel %vm115_vm0, %v1315_v60, %v2636_v39 }
 0x107   :  { %v2710_v44 = vmax.f32 %v728_v4, 0.0  ;;  %1830 = vst [vmem:[%s2927_s5 + $0x70] sm:$0xff] %v728_v4  ;;  %v2715_v43 = vmax.f32 %v659_v30, 0.0  ;;  %1827 = vst [vmem:[%s2927_s5 + $0x68] sm:$0xff] %v659_v30  ;;  %v1319_v58 = vsel %vm847_vm5, %v1317_v45, %v1299_v55  ;;  %v1416_v15 = vrot.slane %v2636_v39, 1 }
 0x108   :  { %1828 = vst [vmem:[%s2928_s6 + $0x60] sm:$0xff] %v2701_v35  ;;  %v2726_v23 = vmax.f32 %v730_v37, 0.0  ;;  %1831 = vst [vmem:[%s2927_s5 + $0x78] sm:$0xff] %v730_v37  ;;  %v882_v60 = vrot.slane %v2701_v35, 3  ;;  %v826_v54 = vrot.slane %v2701_v35, 2  ;;  %v1068_v0 = vrot.slane %v2701_v35, 4 }
 0x109   :  { %1832 = vst [vmem:[%s2928_s6 + $0x70] sm:$0xff] %v2710_v44  ;;  %1829 = vst [vmem:[%s2928_s6 + $0x68] sm:$0xff] %v2715_v43  ;;  %v883_v29 = vrot.slane %v2715_v43, 3  ;;  %v827_v52 = vrot.slane %v2715_v43, 2  ;;  %v886_v1 = vrot.slane %v2710_v44, 2  ;;  %v832_v55 = vrot.slane %v2710_v44, 1 }
 0x10a   :  { %1833 = vst [vmem:[%s2928_s6 + $0x78] sm:$0xff] %v2726_v23  ;;  %v887_v56 = vrot.slane %v2726_v23, 2  ;;  %v833_v57 = vrot.slane %v2726_v23, 1  ;;  %v900_v22 = vsel %vm850_vm7, %v898_v5, %v882_v60  ;;  %v851_v33 = vsel %vm850_vm7, %v848_v51, %v826_v54 }
 0x10b   :  { %v901_v4 = vsel %vm850_vm7, %v899_v32, %v883_v29  ;;  %v852_v30 = vsel %vm850_vm7, %v849_v31, %v827_v52  ;;  %v902_v49 = vsel %vm853_vm6, %v900_v22, %v886_v1  ;;  %v854_v37 = vsel %vm853_vm6, %v851_v33, %v832_v55 }
 0x10c   :  { %v903_v45 = vsel %vm853_vm6, %v901_v4, %v887_v56  ;;  %v855_v36 = vsel %vm853_vm6, %v852_v30, %v833_v57  ;;  %v1069_v34 = vrot.slane %v2715_v43, 4  ;;  %v1073_v26 = vrot.slane %v2726_v23, 3 }
 0x10d   :  { %972 = vmatprep.mubr.f32.mxu0 %v903_v45  ;;  %1042 = vmatprep.mubr.f32.mxu1 %v855_v36  ;;  %v1186_v5 = vrot.slane %v2715_v43, 5  ;;  %v1190_v32 = vrot.slane %v2726_v23, 4  ;;  %v1072_v31 = vrot.slane %v2710_v44, 3  ;;  %v1086_v51 = vsel %vm850_vm7, %v1084_v2, %v1068_v0 }
 0x10e   :  { %973 = vmatmul.mubr.f32.vlgmr.msra.gmra.mrb[8].mxu0 %v902_v49  ;;  %1043 = vmatmul.mubr.f32.vlgmr.msra.gmra.mrb[8].mxu1 %v854_v37  ;;  %v1087_v60 = vsel %vm850_vm7, %v1085_v63, %v1069_v34  ;;  %v1185_v54 = vrot.slane %v2701_v35, 5  ;;  %v1189_v29 = vrot.slane %v2710_v44, 4  ;;  %v1303_v52 = vrot.slane %v2715_v43, 6 }
 0x10f   :  { %v2938_v36 = vpack.c.bf16 %v2334_v8, %v2329_v6  ;;  %v2939_v1 = vpack.c.bf16 %v2344_v10, %v2339_v9  ;;  %v1089_v2 = vsel %vm853_vm6, %v1087_v60, %v1073_v26  ;;  %v1204_v0 = vsel %vm850_vm7, %v1202_v48, %v1186_v5 }
 0x110   :  { %v1088_v34 = vsel %vm853_vm6, %v1086_v51, %v1072_v31  ;;  %v1307_v63 = vrot.slane %v2726_v23, 5  ;;  %1158 = vmatprep.mubr.f32.mxu0 %v1089_v2  ;;  %v1206_v55 = vsel %vm853_vm6, %v1204_v0, %v1190_v32  ;;  %v1203_v56 = vsel %vm850_vm7, %v1201_v41, %v1185_v54 }
 0x111   :  { %1910 = vmatpush1.bf16.xpose.msra.mxu0 %v2938_v36  ;;  %1914 = vmatpush1.bf16.xpose.msra.mxu1 %v2939_v1  ;;  %v2940_v6 = vpack.c.bf16 %v2354_v12, %v2349_v11  ;;  %v1321_v8 = vsel %vm850_vm7, %v1319_v58, %v1303_v52  ;;  %v1420_v9 = vrot.slane %v2715_v43, 7  ;;  %v1205_v10 = vsel %vm853_vm6, %v1203_v56, %v1189_v29 }
 0x112   :  { %1275 = vmatprep.mubr.f32.mxu1 %v1206_v55  ;;  %v2941_v26 = vpack.c.bf16 %v2364_v14, %v2359_v13  ;;  %v1323_v48 = vsel %vm853_vm6, %v1321_v8, %v1307_v63  ;;  %v1424_v57 = vrot.slane %v2726_v23, 6  ;;  %v1434_v41 = vsel %vm115_vm0, %v2643_v7, %v1416_v15 }
 0x113   :  { %1916 = vmatprep.subr.bf16.mxu0 %v2940_v6  ;;  %v1436_v11 = vsel %vm847_vm5, %v1434_v41, %v2649_v53  ;;  %v1290_v12 = vrot.slane %v2537_v62, 2  ;;  %v1294_v58 = vrot.slane %v2547_v28, 1  ;;  %v1298_v22 = vrot.slane %v2631_v61, 7 }
 0x114   :  { %1920 = vmatprep.subr.bf16.mxu1 %v2941_v26  ;;  %v1438_v33 = vsel %vm850_vm7, %v1436_v11, %v1420_v9  ;;  %v1302_v13 = vrot.slane %v2701_v35, 6  ;;  %v1306_v14 = vrot.slane %v2710_v44, 5  ;;  %v1407_v4 = vrot.slane %v2537_v62, 3 }
 0x115   :  { %v1440_v30 = vsel %vm853_vm6, %v1438_v33, %v1424_v57  ;;  %v1312_v7 = vsel %vm839_vm3, %v2535_v59, %v1290_v12  ;;  %v1411_v15 = vrot.slane %v2547_v28, 2  ;;  %v1415_v49 = vrot.slane %v2621_v40, 1 }
 0x116   :  { %v1314_v37 = vsel %vm842_vm4, %v1312_v7, %v1294_v58  ;;  %v1419_v45 = vrot.slane %v2701_v35, 7  ;;  %v1423_v5 = vrot.slane %v2710_v44, 6  ;;  %v1429_v32 = vsel %vm839_vm3, %v2544_v3, %v1407_v4  ;;  %v2951_v4 = vld [vmem:[#allocation6_spill] sm:$0xff] }
 0x117   :  { %v1316_v31 = vsel %vm115_vm0, %v1314_v37, %v2621_v40  ;;  %v1431_v59 = vsel %vm842_vm4, %v1429_v32, %v1411_v15  ;;  %v1525_v51 = vrot.slane %v2552_v27, 4  ;;  %v1529_v60 = vrot.slane %v2563_v38, 3  ;;  %v2953_v37 = vld [vmem:[#allocation8_spill] sm:$0xff] }
 0x118   :  { %1159 = vmatmul.mubr.f32.vlgmr.msra.gmra.mrb[10].mxu0 %v1088_v34  ;;  %1276 = vmatmul.mubr.f32.vlgmr.msra.gmra.mrb[10].mxu1 %v1205_v10  ;;  %v2942_v54 = vpack.c.bf16 %v2376_v17, %v2371_v16  ;;  %v1318_v29 = vsel %vm847_vm5, %v1316_v31, %v1298_v22  ;;  %v1433_v3 = vsel %vm115_vm0, %v1431_v59, %v1415_v49  ;;  %v1533_v52 = vrot.slane %v2636_v39, 2 }
 0x119   :  { %1392 = vmatprep.mubr.f32.mxu0 %v1323_v48  ;;  %v1537_v36 = vrot.slane %v2649_v53, 1  ;;  %v2943_v1 = vpack.c.bf16 %v2386_v19, %v2381_v18  ;;  %1509 = vmatprep.mubr.f32.mxu1 %v1440_v30  ;;  %v1320_v2 = vsel %vm850_vm7, %v1318_v29, %v1302_v13  ;;  %v1435_v16 = vsel %vm847_vm5, %v1433_v3, %v2631_v61 }
 0x11a   :  { %1918 = vmatpush1.bf16.xpose.msra.mxu0 %v2942_v54  ;;  %v1541_v17 = vrot.slane %v2726_v23, 7  ;;  %v2944_v0 = vrot.slane %v2471_v50, 5  ;;  %v2945_v34 = vrot.slane %v2458_v47, 6  ;;  %v1322_v55 = vsel %vm853_vm6, %v1320_v2, %v1306_v14  ;;  %v2950_v14 = vld [vmem:[#allocation5_spill] sm:$0xff] }
 0x11b   :  { %1922 = vmatpush1.bf16.xpose.msra.mxu1 %v2943_v1  ;;  %v1437_v56 = vsel %vm850_vm7, %v1435_v16, %v1419_v45  ;;  %v2946_v18 = vpack.c.bf16 %v2396_v21, %v2391_v20  ;;  %v2947_v19 = vpack.c.bf16 %v2408_v25, %v2403_v24  ;;  %v1642_v8 = vrot.slane %v2552_v27, 5  ;;  %v2954_v45 = vld [vmem:[#allocation7_spill] sm:$0xff] }
 0x11c   :  { %v1545_v63 = vsel %vm836_vm2, %v2945_v34, %v2944_v0  ;;  %v1439_v9 = vsel %vm853_vm6, %v1437_v56, %v1423_v5  ;;  %v1646_v26 = vrot.slane %v2563_v38, 4  ;;  %v1650_v48 = vrot.slane %v2636_v39, 3 }
 0x11d   :  { %1924 = vmatprep.subr.bf16.mxu0 %v2946_v18  ;;  %1928 = vmatprep.subr.bf16.mxu1 %v2947_v19  ;;  %v1547_v6 = vsel %vm839_vm3, %v1545_v63, %v1525_v51  ;;  %v1654_v20 = vrot.slane %v2649_v53, 2  ;;  %v1658_v21 = vrot.slane %v2715_v43, 1  ;;  %v2948_v24 = vrot.slane %v2471_v50, 6 }
 0x11e   :  { %v1549_v10 = vsel %vm842_vm4, %v1547_v6, %v1529_v60  ;;  %v2949_v25 = vrot.slane %v2458_v47, 7  ;;  %v1516_v38 = vrot.slane %v2443_v42, 6  ;;  %v1520_v39 = vrot.slane %v2453_v46, 5 }
 0x11f   :  { %v1551_v57 = vsel %vm115_vm0, %v1549_v10, %v1533_v52  ;;  %v1524_v58 = vrot.slane %v2537_v62, 4  ;;  %v1528_v50 = vrot.slane %v2547_v28, 3  ;;  %v1532_v33 = vrot.slane %v2621_v40, 2 }
 0x120   :  { %v1662_v27 = vsel %vm836_vm2, %v2949_v25, %v2948_v24  ;;  %v1553_v41 = vsel %vm847_vm5, %v1551_v57, %v1537_v36  ;;  %v1536_v13 = vrot.slane %v2631_v61, 1  ;;  %v2952_v30 = vpack.c.bf16 %v2950_v14, %v2951_v4 }
 0x121   :  { %v1664_v11 = vsel %vm839_vm3, %v1662_v27, %v1642_v8  ;;  %v1555_v12 = vsel %vm850_vm7, %v1553_v41, %v2715_v43  ;;  %1393 = vmatmul.mubr.f32.vlgmr.msra.gmra.mrb[12].mxu0 %v1322_v55  ;;  %v1540_v7 = vrot.slane %v2710_v44, 7  ;;  %v1544_v15 = vsel %vm836_vm2, %v1516_v38, %v1520_v39  ;;  %v1834_v41 = vld [vmem:[%s2926_s4] ss:$0 sm:$0xff] }
 0x122   :  { %v1666_v53 = vsel %vm842_vm4, %v1664_v11, %v1646_v26  ;;  %v1557_v47 = vsel %vm853_vm6, %v1555_v12, %v1541_v17  ;;  %1510 = vmatmul.mubr.f32.vlgmr.msra.gmra.mrb[12].mxu1 %v1439_v9  ;;  %1926 = vmatpush1.bf16.xpose.msra.mxu0 %v2952_v30  ;;  %v1633_v49 = vrot.slane %v2443_v42, 7  ;;  %v2955_v5 = vpack.c.bf16 %v2953_v37, %v2954_v45 }
 0x123   :  { %v1668_v22 = vsel %vm115_vm0, %v1666_v53, %v1650_v48  ;;  %1626 = vmatprep.mubr.f32.mxu0 %v1557_v47  ;;  %v1546_v31 = vsel %vm839_vm3, %v1544_v15, %v1524_v58  ;;  %v1637_v59 = vrot.slane %v2453_v46, 6  ;;  %v1641_v51 = vrot.slane %v2537_v62, 5 }
 0x124   :  { %v1670_v43 = vsel %vm847_vm5, %v1668_v22, %v1654_v20  ;;  %1930 = vmatpush1.bf16.xpose.msra.mxu1 %v2955_v5  ;;  %v1548_v54 = vsel %vm842_vm4, %v1546_v31, %v1528_v50  ;;  %v1645_v42 = vrot.slane %v2547_v28, 4  ;;  %v1649_v29 = vrot.slane %v2621_v40, 3 }
 0x125   :  { %v1672_v32 = vsel %vm850_vm7, %v1670_v43, %v1658_v21  ;;  %v1550_v3 = vsel %vm115_vm0, %v1548_v54, %v1532_v33  ;;  %v1653_v52 = vrot.slane %v2631_v61, 2  ;;  %v1661_v36 = vsel %vm836_vm2, %v1633_v49, %v1637_v59 }
 0x126   :  { %v1674_v60 = vsel %vm853_vm6, %v1672_v32, %v2726_v23  ;;  %v1552_v46 = vsel %vm847_vm5, %v1550_v3, %v1536_v13  ;;  %v1657_v62 = vrot.slane %v2701_v35, 1  ;;  %v1663_v1 = vsel %vm839_vm3, %v1661_v36, %v1641_v51 }
 0x127   :  { %1743 = vmatprep.mubr.f32.mxu1 %v1674_v60  ;;  %v1554_v23 = vsel %vm850_vm7, %v1552_v46, %v2701_v35  ;;  %v1665_v28 = vsel %vm842_vm4, %v1663_v1, %v1645_v42 }
 0x128   :  { %v1556_v40 = vsel %vm853_vm6, %v1554_v23, %v1540_v7  ;;  %v1667_v2 = vsel %vm115_vm0, %v1665_v28, %v1649_v29 }
 0x129   :  { %1627 = vmatmul.mubr.f32.vlgmr.msra.gmra.mrb[14].mxu0 %v1556_v40  ;;  %v1669_v61 = vsel %vm847_vm5, %v1667_v2, %v1653_v52 }
 0x12a   :  { %v1671_v16 = vsel %vm850_vm7, %v1669_v61, %v1657_v62 }
 0x12b   :  { %v1673_v17 = vsel %vm853_vm6, %v1671_v16, %v2710_v44 }
 0x12c   :  { %1744 = vmatmul.mubr.f32.vlgmr.msra.gmra.mrb[14].mxu1 %v1673_v17 }
 0x1e1   :  { %v974_v0 = vpop.f32.mrb[8].mxu0  ;;  %v1044_v34 = vpop.f32.mrb[8].mxu1 }
 0x1e2   :  { %v1045_v63 = vadd.f32 %v1044_v34, %v974_v0  ;;  %v976_v55 = vpop.f32.mrb[9].mxu0  ;;  %v1046_v35 = vpop.f32.mrb[9].mxu1 }
 0x1eb   :  { %v1160_v56 = vpop.f32.mrb[10].mxu0  ;;  %v1277_v18 = vpop.f32.mrb[10].mxu1 }
 0x1ec   :  { %v1164_v19 = vadd.f32 %v1160_v56, %v1045_v63  ;;  %v1162_v6 = vpop.f32.mrb[11].mxu0  ;;  %v1279_v8 = vpop.f32.mrb[11].mxu1 }
 0x1ee   :  { %v1281_v9 = vadd.f32 %v1277_v18, %v1164_v19 }
 0x1f4   :  { %v1394_v10 = vpop.f32.mrb[12].mxu0 }
 0x1f5   :  { %v1398_v26 = vadd.f32 %v1394_v10, %v1281_v9  ;;  %v1511_v48 = vpop.f32.mrb[12].mxu1  ;;  %v1396_v57 = vpop.f32.mrb[13].mxu0 }
 0x1f6   :  { %v1513_v20 = vpop.f32.mrb[13].mxu1 }
 0x1f7   :  { %v1515_v21 = vadd.f32 %v1511_v48, %v1398_v26 }
 0x1fc   :  { %v1628_v24 = vpop.f32.mrb[14].mxu0 }
 0x1fd   :  { %v1632_v44 = vadd.f32 %v1628_v24, %v1515_v21  ;;  %v1630_v25 = vpop.f32.mrb[15].mxu0 }
 0x1ff   :  { %v1745_v27 = vpop.f32.mrb[14].mxu1 }
 0x200   :  { %v1749_v11 = vadd.f32 %v1745_v27, %v1632_v44  ;;  %v1747_v38 = vpop.f32.mrb[15].mxu1 }
 0x202   :  { %v1757_v39 = vadd.f32 %v1834_v41, %v1749_v11 }
 0x204   :  { %1759 = vst.msk [vmem:[#allocation2] sm:$0xff] %vm1758_vm8, %v1757_v39 }
 0x205   :  { %1946 = shalt.err (!%p1943_p4)
}
 0x206   :  { %s1947_s20 = scalar_lea.hbm %s2929_s7, 128 }
 0x207   :  { %p1948_p5 = scmp.ne.s32.totalorder %s2929_s7, %s1947_s20  ;;  %p1951_p6 = scmp.lt.u32.totalorder %s1947_s20, %s2929_s7 }
 0x209   :  { %p1953_p7 = pnand %p1951_p6, %p1948_p5 }
 0x20b   :  { %1956 = shalt.err (!%p1953_p7)
}
 0x20c   :  { %1773 = dma.vmem_to_hbm [thread:$0]  %s1771_s16, 128, %s2929_s7, [#allocation3]  }
 0x20d   :  { %1957 = dma.done.wait [#allocation3], 128  }
 0x20e   :  { %1958 = vsyncadd [#allocation3], 4294967168 }
 0x20f   :  { %1781 = vsyncpa [#allocation3], 1 }

</bundles_post_ra>
